<compile_context>
chip_gen: v6e
topology: v6e:2x2x1
jax: 0.10.0
libtpu: 0.0.40
codegen_flags: <defaults>
</compile_context>

<pallas_src>
import functools

import jax
import jax.numpy as jnp
from jax.experimental import pallas as pl
from jax.experimental.pallas import tpu as pltpu


LAYER_DIMS = (1024, 512, 256, 128, 64, 102)   # scaled analog of the original
LANE = 128                                    # pad narrow feature dims to lane width
SUBLANE = 8
TM = 128                                      # M tile for large batches
ACT_DTYPE = jnp.bfloat16                      # activation / input / output dtype
WEIGHT_DTYPE = jnp.bfloat16                   # MXU-native weights
BIAS_DTYPE = jnp.float32                      # biases stay f32 (tiny, better parity)


def _round_up(n, m):
    return (n + m - 1) // m * m


# ------------------------------- fused kernel -----------------------------------

def _fused_mlp_kernel(x_ref, *refs, num_layers):
    """refs = (w1, b1, w2, b2, ..., wL, bL, o_ref).

    x_ref is one (tm, K0) bf16 tile; weights/biases are whole arrays resident
    in VMEM across all grid steps (their index_maps are constant in M).
    """
    o_ref = refs[-1]
    wb = refs[:-1]

    h = x_ref[...]                                     # (tm, K0) bf16
    for i in range(num_layers):
        w_ref = wb[2 * i]
        b_ref = wb[2 * i + 1]
        # bf16 x bf16 MXU matmul, f32 accumulation
        y = jnp.dot(h, w_ref[...], preferred_element_type=jnp.float32)
        y = y + b_ref[...]                             # (tm, N) + (1, N) f32 bias
        if i != num_layers - 1:
            y = jnp.maximum(y, 0.0)                    # fused ReLU; dropout = identity
            h = y.astype(ACT_DTYPE)                    # carry activation in bf16
        else:
            h = y
    o_ref[...] = h.astype(o_ref.dtype)


def fused_classifier(x_pad, params, *, tm):
    """x_pad: (M_pad, K0) bf16, M_pad % tm == 0; params: [(W bf16, b f32), ...]."""
    m_pad, k0 = x_pad.shape
    num_layers = len(params)
    out_pad = params[-1][0].shape[1]
    assert m_pad % tm == 0
    grid_m = m_pad // tm

    flat = []
    in_specs = [pl.BlockSpec((tm, k0), lambda i: (i, 0))]      # x tile streams in M
    for w, b in params:
        flat += [w, b]
        # Constant index_map in M -> each weight/bias DMA'd once, stays resident.
        in_specs.append(pl.BlockSpec(w.shape, lambda i: (0, 0)))
        in_specs.append(pl.BlockSpec(b.shape, lambda i: (0, 0)))

    flops = 0
    bytes_accessed = (x_pad.size * x_pad.dtype.itemsize
                      + m_pad * out_pad * jnp.dtype(ACT_DTYPE).itemsize)
    for w, b in params:
        flops += 2 * m_pad * w.shape[0] * w.shape[1]
        bytes_accessed += w.size * w.dtype.itemsize + b.size * b.dtype.itemsize

    kernel = functools.partial(_fused_mlp_kernel, num_layers=num_layers)
    return pl.pallas_call(
        kernel,
        out_shape=jax.ShapeDtypeStruct((m_pad, out_pad), ACT_DTYPE),
        grid_spec=pltpu.PrefetchScalarGridSpec(
            num_scalar_prefetch=0,
            grid=(grid_m,),
            in_specs=in_specs,
            out_specs=pl.BlockSpec((tm, out_pad), lambda i: (i, 0)),
        ),
        compiler_params=pltpu.CompilerParams(
            dimension_semantics=("parallel",),       # v7x: M tiles across both TCs
            vmem_limit_bytes=32 * 1024 * 1024,       # explicit headroom (v5e default 16 MiB)
        ),
        cost_estimate=pl.CostEstimate(
            flops=flops, transcendentals=0, bytes_accessed=bytes_accessed
        ),
    )(x_pad, *flat)


# -------------------- parameter construction (deterministic) --------------------

def init_params(key, dims=LAYER_DIMS):
    """Returns padded (W, b) per layer: W (K_pad, N_pad) bf16, b (1, N_pad) f32.

    y = x @ W + b.  Padded rows/cols are exactly zero, so extra lanes stay 0
    through ReLU and do not affect real outputs.
    """
    pdims = [dims[0]] + [_round_up(d, LANE) for d in dims[1:]]
    params = []
    for i in range(len(dims) - 1):
        fan_in, fan_out = dims[i], dims[i + 1]
        pin, pout = pdims[i], pdims[i + 1]
        key, kw, kb = jax.random.split(key, 3)
        w = jax.random.normal(kw, (fan_in, fan_out), jnp.float32) * (
            1.0 / jnp.sqrt(fan_in)
        )
        b = jax.random.normal(kb, (1, fan_out), jnp.float32) * 0.01
        w_pad = jnp.zeros((pin, pout), jnp.float32).at[:fan_in, :fan_out].set(w)
        b_pad = jnp.zeros((1, pout), jnp.float32).at[:, :fan_out].set(b)
        params.append((w_pad.astype(WEIGHT_DTYPE), b_pad.astype(BIAS_DTYPE)))
    return params


# ----------------------------------- forward ------------------------------------

@jax.jit
def classifier_forward(x_nchw, params):
    """Equivalent of Classifier.forward (eval mode: dropout == identity)."""
    n = x_nchw.shape[0]
    x = x_nchw.reshape(n, -1).astype(ACT_DTYPE)       # x.view(x.shape[0], -1), bf16

    # Tile choice: single small tile for tiny batches, TM tiles for big ones.
    tm = TM if n >= TM else _round_up(max(n, SUBLANE), SUBLANE)
    m_pad = _round_up(n, tm)
    if m_pad != n:
        x = jnp.pad(x, ((0, m_pad - n), (0, 0)))

    out_pad = fused_classifier(x, params, tm=tm)      # (m_pad, 128) bf16
    return out_pad[:n, : LAYER_DIMS[-1]].astype(jnp.float32)   # (n, 102) f32


# ------------------------------------ main --------------------------------------

if __name__ == "__main__":
    key = jax.random.PRNGKey(0)
    k_x, k_p = jax.random.split(key)

    # layout: NCHW, batch=2, C=4, H=W=16  ->  flattened features = 1024
    x = jax.random.normal(k_x, (2, 4, 16, 16), jnp.float32)
    params = init_params(k_p)

    logits = classifier_forward(x, params)
    logits = jax.block_until_ready(logits)

    assert logits.shape == (2, 102), logits.shape
    assert logits.dtype == jnp.float32

    # Reference in plain JAX with the exact same dtype pipeline as the kernel
    # (bf16 input/activations/weights, f32 accumulate + bias, bf16 output).
    h = x.reshape(2, -1).astype(jnp.bfloat16)
    for i, (w, b) in enumerate(params):
        y = jnp.dot(h, w, preferred_element_type=jnp.float32) + b
        if i != len(params) - 1:
            h = jnp.maximum(y, 0.0).astype(jnp.bfloat16)
        else:
            h = y
    ref = h.astype(jnp.bfloat16).astype(jnp.float32)[:, : LAYER_DIMS[-1]]

    assert jnp.allclose(logits, ref, atol=3e-2, rtol=3e-2), (
        float(jnp.max(jnp.abs(logits - ref)))
    )

    print("KERNEL_OK")
</pallas_src>

<mosaic_0001>
module attributes {stable_mosaic.version = 11 : i64} {
  func.func @_fused_mlp_kernel(%arg0: i32, %arg1: memref<8x1024xbf16, #tpu.memory_space<vmem>>, %arg2: memref<1024x512xbf16, #tpu.memory_space<vmem>>, %arg3: memref<1x512xf32, #tpu.memory_space<vmem>>, %arg4: memref<512x256xbf16, #tpu.memory_space<vmem>>, %arg5: memref<1x256xf32, #tpu.memory_space<vmem>>, %arg6: memref<256x128xbf16, #tpu.memory_space<vmem>>, %arg7: memref<1x128xf32, #tpu.memory_space<vmem>>, %arg8: memref<128x128xbf16, #tpu.memory_space<vmem>>, %arg9: memref<1x128xf32, #tpu.memory_space<vmem>>, %arg10: memref<128x128xbf16, #tpu.memory_space<vmem>>, %arg11: memref<1x128xf32, #tpu.memory_space<vmem>>, %arg12: memref<8x128xbf16, #tpu.memory_space<vmem>>) attributes {dimension_semantics = [#tpu.dimension_semantics<parallel>], iteration_bounds = array<i64: 1>, scalar_prefetch = 0 : i64, scratch_operands = 0 : i64, tpu.core_type = #tpu.core_type<tc>, window_params = [{transform_indices = @transform_0, window_bounds = array<i64: 8, 1024>}, {pipeline_mode = #tpu.pipeline_mode<synchronous>, transform_indices = @transform_1, window_bounds = array<i64: 1024, 512>}, {pipeline_mode = #tpu.pipeline_mode<synchronous>, transform_indices = @transform_2, window_bounds = array<i64: 1, 512>}, {pipeline_mode = #tpu.pipeline_mode<synchronous>, transform_indices = @transform_3, window_bounds = array<i64: 512, 256>}, {pipeline_mode = #tpu.pipeline_mode<synchronous>, transform_indices = @transform_4, window_bounds = array<i64: 1, 256>}, {pipeline_mode = #tpu.pipeline_mode<synchronous>, transform_indices = @transform_5, window_bounds = array<i64: 256, 128>}, {pipeline_mode = #tpu.pipeline_mode<synchronous>, transform_indices = @transform_6, window_bounds = array<i64: 1, 128>}, {pipeline_mode = #tpu.pipeline_mode<synchronous>, transform_indices = @transform_7, window_bounds = array<i64: 128, 128>}, {pipeline_mode = #tpu.pipeline_mode<synchronous>, transform_indices = @transform_8, window_bounds = array<i64: 1, 128>}, {pipeline_mode = #tpu.pipeline_mode<synchronous>, transform_indices = @transform_9, window_bounds = array<i64: 128, 128>}, {pipeline_mode = #tpu.pipeline_mode<synchronous>, transform_indices = @transform_10, window_bounds = array<i64: 1, 128>}, {transform_indices = @transform_11, window_bounds = array<i64: 8, 128>}]} {
    %c0 = arith.constant 0 : index
    %c0_0 = arith.constant 0 : index
    %0 = vector.load %arg1[%c0, %c0_0] : memref<8x1024xbf16, #tpu.memory_space<vmem>>, vector<8x1024xbf16>
    %c0_1 = arith.constant 0 : index
    %c0_2 = arith.constant 0 : index
    %1 = vector.load %arg2[%c0_1, %c0_2] : memref<1024x512xbf16, #tpu.memory_space<vmem>>, vector<1024x512xbf16>
    %cst = arith.constant dense<0.000000e+00> : vector<8x512xf32>
    %2 = tpu.matmul %0, %1, %cst {dimension_numbers = #tpu.dot_dimension_numbers<[1], [0], [0], [1], [0, 0, 1, 1], [], []>} : vector<8x1024xbf16>, vector<1024x512xbf16>, vector<8x512xf32> -> vector<8x512xf32>
    %c0_3 = arith.constant 0 : index
    %c0_4 = arith.constant 0 : index
    %3 = vector.load %arg3[%c0_3, %c0_4] : memref<1x512xf32, #tpu.memory_space<vmem>>, vector<1x512xf32>
    %4 = vector.broadcast %3 : vector<1x512xf32> to vector<8x512xf32>
    %5 = arith.addf %2, %4 : vector<8x512xf32>
    %cst_5 = arith.constant 0.000000e+00 : f32
    %6 = vector.broadcast %cst_5 : f32 to vector<8x512xf32>
    %7 = arith.maximumf %5, %6 : vector<8x512xf32>
    %8 = arith.truncf %7 : vector<8x512xf32> to vector<8x512xbf16>
    %c0_6 = arith.constant 0 : index
    %c0_7 = arith.constant 0 : index
    %9 = vector.load %arg4[%c0_6, %c0_7] : memref<512x256xbf16, #tpu.memory_space<vmem>>, vector<512x256xbf16>
    %cst_8 = arith.constant dense<0.000000e+00> : vector<8x256xf32>
    %10 = tpu.matmul %8, %9, %cst_8 {dimension_numbers = #tpu.dot_dimension_numbers<[1], [0], [0], [1], [0, 0, 1, 1], [], []>} : vector<8x512xbf16>, vector<512x256xbf16>, vector<8x256xf32> -> vector<8x256xf32>
    %c0_9 = arith.constant 0 : index
    %c0_10 = arith.constant 0 : index
    %11 = vector.load %arg5[%c0_9, %c0_10] : memref<1x256xf32, #tpu.memory_space<vmem>>, vector<1x256xf32>
    %12 = vector.broadcast %11 : vector<1x256xf32> to vector<8x256xf32>
    %13 = arith.addf %10, %12 : vector<8x256xf32>
    %cst_11 = arith.constant 0.000000e+00 : f32
    %14 = vector.broadcast %cst_11 : f32 to vector<8x256xf32>
    %15 = arith.maximumf %13, %14 : vector<8x256xf32>
    %16 = arith.truncf %15 : vector<8x256xf32> to vector<8x256xbf16>
    %c0_12 = arith.constant 0 : index
    %c0_13 = arith.constant 0 : index
    %17 = vector.load %arg6[%c0_12, %c0_13] : memref<256x128xbf16, #tpu.memory_space<vmem>>, vector<256x128xbf16>
    %cst_14 = arith.constant dense<0.000000e+00> : vector<8x128xf32>
    %18 = tpu.matmul %16, %17, %cst_14 {dimension_numbers = #tpu.dot_dimension_numbers<[1], [0], [0], [1], [0, 0, 1, 1], [], []>} : vector<8x256xbf16>, vector<256x128xbf16>, vector<8x128xf32> -> vector<8x128xf32>
    %c0_15 = arith.constant 0 : index
    %c0_16 = arith.constant 0 : index
    %19 = vector.load %arg7[%c0_15, %c0_16] : memref<1x128xf32, #tpu.memory_space<vmem>>, vector<1x128xf32>
    %20 = vector.broadcast %19 : vector<1x128xf32> to vector<8x128xf32>
    %21 = arith.addf %18, %20 : vector<8x128xf32>
    %cst_17 = arith.constant 0.000000e+00 : f32
    %22 = vector.broadcast %cst_17 : f32 to vector<8x128xf32>
    %23 = arith.maximumf %21, %22 : vector<8x128xf32>
    %24 = arith.truncf %23 : vector<8x128xf32> to vector<8x128xbf16>
    %c0_18 = arith.constant 0 : index
    %c0_19 = arith.constant 0 : index
    %25 = vector.load %arg8[%c0_18, %c0_19] : memref<128x128xbf16, #tpu.memory_space<vmem>>, vector<128x128xbf16>
    %cst_20 = arith.constant dense<0.000000e+00> : vector<8x128xf32>
    %26 = tpu.matmul %24, %25, %cst_20 {dimension_numbers = #tpu.dot_dimension_numbers<[1], [0], [0], [1], [0, 0, 1, 1], [], []>} : vector<8x128xbf16>, vector<128x128xbf16>, vector<8x128xf32> -> vector<8x128xf32>
    %c0_21 = arith.constant 0 : index
    %c0_22 = arith.constant 0 : index
    %27 = vector.load %arg9[%c0_21, %c0_22] : memref<1x128xf32, #tpu.memory_space<vmem>>, vector<1x128xf32>
    %28 = vector.broadcast %27 : vector<1x128xf32> to vector<8x128xf32>
    %29 = arith.addf %26, %28 : vector<8x128xf32>
    %cst_23 = arith.constant 0.000000e+00 : f32
    %30 = vector.broadcast %cst_23 : f32 to vector<8x128xf32>
    %31 = arith.maximumf %29, %30 : vector<8x128xf32>
    %32 = arith.truncf %31 : vector<8x128xf32> to vector<8x128xbf16>
    %c0_24 = arith.constant 0 : index
    %c0_25 = arith.constant 0 : index
    %33 = vector.load %arg10[%c0_24, %c0_25] : memref<128x128xbf16, #tpu.memory_space<vmem>>, vector<128x128xbf16>
    %cst_26 = arith.constant dense<0.000000e+00> : vector<8x128xf32>
    %34 = tpu.matmul %32, %33, %cst_26 {dimension_numbers = #tpu.dot_dimension_numbers<[1], [0], [0], [1], [0, 0, 1, 1], [], []>} : vector<8x128xbf16>, vector<128x128xbf16>, vector<8x128xf32> -> vector<8x128xf32>
    %c0_27 = arith.constant 0 : index
    %c0_28 = arith.constant 0 : index
    %35 = vector.load %arg11[%c0_27, %c0_28] : memref<1x128xf32, #tpu.memory_space<vmem>>, vector<1x128xf32>
    %36 = vector.broadcast %35 : vector<1x128xf32> to vector<8x128xf32>
    %37 = arith.addf %34, %36 : vector<8x128xf32>
    %38 = arith.truncf %37 : vector<8x128xf32> to vector<8x128xbf16>
    %c0_29 = arith.constant 0 : index
    %c0_30 = arith.constant 0 : index
    %39 = vector.load %arg12[%c0_29, %c0_30] : memref<8x128xbf16, #tpu.memory_space<vmem>>, vector<8x128xbf16>
    tpu.vector_store %arg12[%c0_29, %c0_30], %38 {strides = array<i32>} : memref<8x128xbf16, #tpu.memory_space<vmem>>, vector<8x128xbf16>,
    return
  }
  func.func @transform_0(%arg0: i32) -> (i32, i32) {
    %c0_i32 = arith.constant 0 : i32
    %c0_i32_0 = arith.constant 0 : i32
    return %arg0, %c0_i32 : i32, i32
  }
  func.func @transform_1(%arg0: i32) -> (i32, i32) {
    %c0_i32 = arith.constant 0 : i32
    %c0_i32_0 = arith.constant 0 : i32
    %c0_i32_1 = arith.constant 0 : i32
    return %c0_i32, %c0_i32_0 : i32, i32
  }
  func.func @transform_2(%arg0: i32) -> (i32, i32) {
    %c0_i32 = arith.constant 0 : i32
    %c0_i32_0 = arith.constant 0 : i32
    %c0_i32_1 = arith.constant 0 : i32
    return %c0_i32, %c0_i32_0 : i32, i32
  }
  func.func @transform_3(%arg0: i32) -> (i32, i32) {
    %c0_i32 = arith.constant 0 : i32
    %c0_i32_0 = arith.constant 0 : i32
    %c0_i32_1 = arith.constant 0 : i32
    return %c0_i32, %c0_i32_0 : i32, i32
  }
  func.func @transform_4(%arg0: i32) -> (i32, i32) {
    %c0_i32 = arith.constant 0 : i32
    %c0_i32_0 = arith.constant 0 : i32
    %c0_i32_1 = arith.constant 0 : i32
    return %c0_i32, %c0_i32_0 : i32, i32
  }
  func.func @transform_5(%arg0: i32) -> (i32, i32) {
    %c0_i32 = arith.constant 0 : i32
    %c0_i32_0 = arith.constant 0 : i32
    %c0_i32_1 = arith.constant 0 : i32
    return %c0_i32, %c0_i32_0 : i32, i32
  }
  func.func @transform_6(%arg0: i32) -> (i32, i32) {
    %c0_i32 = arith.constant 0 : i32
    %c0_i32_0 = arith.constant 0 : i32
    %c0_i32_1 = arith.constant 0 : i32
    return %c0_i32, %c0_i32_0 : i32, i32
  }
  func.func @transform_7(%arg0: i32) -> (i32, i32) {
    %c0_i32 = arith.constant 0 : i32
    %c0_i32_0 = arith.constant 0 : i32
    %c0_i32_1 = arith.constant 0 : i32
    return %c0_i32, %c0_i32_0 : i32, i32
  }
  func.func @transform_8(%arg0: i32) -> (i32, i32) {
    %c0_i32 = arith.constant 0 : i32
    %c0_i32_0 = arith.constant 0 : i32
    %c0_i32_1 = arith.constant 0 : i32
    return %c0_i32, %c0_i32_0 : i32, i32
  }
  func.func @transform_9(%arg0: i32) -> (i32, i32) {
    %c0_i32 = arith.constant 0 : i32
    %c0_i32_0 = arith.constant 0 : i32
    %c0_i32_1 = arith.constant 0 : i32
    return %c0_i32, %c0_i32_0 : i32, i32
  }
  func.func @transform_10(%arg0: i32) -> (i32, i32) {
    %c0_i32 = arith.constant 0 : i32
    %c0_i32_0 = arith.constant 0 : i32
    %c0_i32_1 = arith.constant 0 : i32
    return %c0_i32, %c0_i32_0 : i32, i32
  }
  func.func @transform_11(%arg0: i32) -> (i32, i32) {
    %c0_i32 = arith.constant 0 : i32
    %c0_i32_0 = arith.constant 0 : i32
    return %arg0, %c0_i32 : i32, i32
  }
}

</mosaic_0001>

<bundles_post_ra>
// kernel: classifier_forward.1
= control target key start
LH: loop header
LB: loop body
LE: loop exit
PB: predicated region body
PF: predicated region fallthrough
CT: control target
= control target key end

     0   :  { %16 = vsyncpa [#allocation3], 0  ;;  %s4193_s0 = inlined_call_operand.vmem [shape: bf16[8,1024], index: 0, kind: input, shape index: {}]   ;;  %s4194_s1 = inlined_call_operand.hbm [shape: bf16[1024,512], index: 1, kind: input, shape index: {}]   ;;  %s4195_s2 = inlined_call_operand.vmem [shape: f32[1,512], index: 2, kind: input, shape index: {}]   ;;  %s4196_s3 = inlined_call_operand.hbm [shape: bf16[512,256], index: 3, kind: input, shape index: {}]   ;;  %s4197_s4 = inlined_call_operand.vmem [shape: f32[1,256], index: 4, kind: input, shape index: {}]   ;;  %s4198_s5 = inlined_call_operand.vmem [shape: bf16[256,128], index: 5, kind: input, shape index: {}]   ;;  %s4199_s6 = inlined_call_operand.vmem [shape: f32[1,128], index: 6, kind: input, shape index: {}]   ;;  %s4200_s7 = inlined_call_operand.vmem [shape: bf16[128,128], index: 7, kind: input, shape index: {}]   ;;  %s4201_s8 = inlined_call_operand.vmem [shape: f32[1,128], index: 8, kind: input, shape index: {}]   ;;  %s4202_s9 = inlined_call_operand.vmem [shape: bf16[128,128], index: 9, kind: input, shape index: {}]   ;;  %s4203_s10 = inlined_call_operand.vmem [shape: f32[1,128], index: 10, kind: input, shape index: {}]   ;;  %s4204_s11 = inlined_call_operand.vmem [shape: bf16[8,128], index: 11, kind: output, shape index: {}]  }
   0x1   :  { %17 = vsyncpa [#allocation5], 0  ;;  %s3899_s17 = smov [#allocation2]  }
   0x2   :  { %s25_s18 = sshll.u32 %s3899_s17, 4  ;;  %s26_s18 = int_to_ptr.vmem [resolvable:$true] %s25_s18 }
   0x3   :  { %s3863_s19 = scalar_lea.vmem %s26_s18, 32768  ;;  %p3868_p1 = scmp.lt.s32.totalorder %s26_s18, %s26_s18 }
   0x4   :  { %p3864_p0 = scmp.ne.s32.totalorder %s26_s18, %s3863_s19  ;;  %p3869_p2 = scmp.lt.s32.totalorder %s3863_s19, %s3863_s19 }
   0x6   :  { %p3870_p3 = por %p3869_p2, %p3868_p1 }
   0x8   :  { %p3871_p4 = pnand %p3870_p3, %p3864_p0 }
   0xa   :  { %3874 = shalt.err (!%p3871_p4)
}
   0xb   :  { %s3900_s20 = smov 256   ;;  %s3901_s21 = smov 16  }
   0xc   :  { %31 = dma.hbm_to_vmem [thread:$0]  %s4194_s1, 32768, %s26_s18, [#allocation3], %s3900_s20, %s3900_s20, %s3901_s21  }
   0xd   :  { %s3902_s24 = smov [#allocation4]  }
   0xe   :  { %s39_s25 = sshll.u32 %s3902_s24, 4  ;;  %s40_s25 = int_to_ptr.vmem [resolvable:$true] %s39_s25 }
   0xf   :  { %s3883_s26 = scalar_lea.vmem %s40_s25, 8192  ;;  %p3888_p6 = scmp.lt.s32.totalorder %s40_s25, %s40_s25 }
  0x10   :  { %p3884_p5 = scmp.ne.s32.totalorder %s40_s25, %s3883_s26  ;;  %p3889_p7 = scmp.lt.s32.totalorder %s3883_s26, %s3883_s26 }
  0x12   :  { %p3890_p8 = por %p3889_p7, %p3888_p6 }
  0x14   :  { %p3891_p9 = pnand %p3890_p8, %p3884_p5 }
  0x16   :  { %3894 = shalt.err (!%p3891_p9)
}
  0x17   :  { %s3903_s27 = smov 128   ;;  %s3904_s28 = smov 8  }
  0x18   :  { %45 = dma.hbm_to_vmem [thread:$0]  %s4196_s3, 8192, %s40_s25, [#allocation5], %s3903_s27, %s3903_s27, %s3904_s28  }
  0x19   :  { %3895 = dma.done.wait [#allocation3], 32768  }
  0x1a   :  { %3896 = vsyncadd [#allocation3], 4294934528 }
  0x1b   :  { %3897 = dma.done.wait [#allocation5], 8192  }
  0x1c   :  { %3898 = vsyncadd [#allocation5], 4294959104  ;;  %v3335_v0 = vld [vmem:[#allocation2 + $0xe4] ss:$16 sps:$4 sm:$0xff]   ;;  %v3339_v2 = vld [vmem:[#allocation2 + $0xe0] ss:$16 sps:$4 sm:$0xff]  }
  0x1d   :  { %v3337_v1 = vld [vmem:[#allocation2 + $0x2e4] ss:$16 sps:$4 sm:$0xff]   ;;  %1657 = vmatprep.subr.bf16.mxu0 %v3335_v0  ;;  %v3340_v3 = vld [vmem:[#allocation2 + $0x2e0] ss:$16 sps:$4 sm:$0xff]   ;;  %v68_v48 = vld [vmem:[%s4193_s0 + $0x8] sm:$0xff]  ;;  %vm3906_vm0 = vmmov 0  }
  0x1e   :  { %1698 = vmatprep.subr.bf16.mxu1 %v3337_v1  ;;  %v3341_v4 = vld [vmem:[#allocation2 + $0xc4] ss:$16 sps:$4 sm:$0xff]   ;;  %1658 = vmatpush1.bf16.msra.mxu0 %v3339_v2  ;;  %v3345_v6 = vld [vmem:[#allocation2 + $0xc0] ss:$16 sps:$4 sm:$0xff]   ;;  %v3981_v51 = vcombine.high %v68_v48, %v68_v48 }
  0x1f   :  { %1699 = vmatpush1.bf16.msra.mxu1 %v3340_v3  ;;  %v3343_v5 = vld [vmem:[#allocation2 + $0x2c4] ss:$16 sps:$4 sm:$0xff]   ;;  %1659 = vmatprep.subr.bf16.mxu0 %v3341_v4  ;;  %v3346_v7 = vld [vmem:[#allocation2 + $0x2c0] ss:$16 sps:$4 sm:$0xff]  }
  0x20   :  { %1700 = vmatprep.subr.bf16.mxu1 %v3343_v5  ;;  %v3347_v8 = vld [vmem:[#allocation2 + $0xa4] ss:$16 sps:$4 sm:$0xff]   ;;  %v3351_v10 = vld [vmem:[#allocation2 + $0xa0] ss:$16 sps:$4 sm:$0xff]   ;;  %1730 = vmatprep.mubr.bf16.mxu1 %v3981_v51 }
  0x21   :  { %v3349_v9 = vld [vmem:[#allocation2 + $0x2a4] ss:$16 sps:$4 sm:$0xff]   ;;  %v3352_v11 = vld [vmem:[#allocation2 + $0x2a0] ss:$16 sps:$4 sm:$0xff]  }
  0x22   :  { %1660 = vmatpush1.bf16.msra.mxu0 %v3345_v6  ;;  %v3353_v12 = vld [vmem:[#allocation2 + $0x84] ss:$16 sps:$4 sm:$0xff]   ;;  %v3357_v14 = vld [vmem:[#allocation2 + $0x80] ss:$16 sps:$4 sm:$0xff]  }
  0x23   :  { %1701 = vmatpush1.bf16.msra.mxu1 %v3346_v7  ;;  %1661 = vmatprep.subr.bf16.mxu0 %v3347_v8  ;;  %v3355_v13 = vld [vmem:[#allocation2 + $0x284] ss:$16 sps:$4 sm:$0xff]   ;;  %v3358_v15 = vld [vmem:[#allocation2 + $0x280] ss:$16 sps:$4 sm:$0xff]   ;;  %v3987_v7 = vcombine.low %v68_v48, %v68_v48 }
  0x24   :  { %1702 = vmatprep.subr.bf16.mxu1 %v3349_v9  ;;  %v3359_v16 = vld [vmem:[#allocation2 + $0x64] ss:$16 sps:$4 sm:$0xff]   ;;  %v3363_v18 = vld [vmem:[#allocation2 + $0x60] ss:$16 sps:$4 sm:$0xff]  }
  0x25   :  { %v3361_v17 = vld [vmem:[#allocation2 + $0x264] ss:$16 sps:$4 sm:$0xff]   ;;  %v3364_v19 = vld [vmem:[#allocation2 + $0x260] ss:$16 sps:$4 sm:$0xff]  }
  0x26   :  { %1662 = vmatpush1.bf16.msra.mxu0 %v3351_v10  ;;  %v3365_v20 = vld [vmem:[#allocation2 + $0x44] ss:$16 sps:$4 sm:$0xff]   ;;  %v3369_v22 = vld [vmem:[#allocation2 + $0x40] ss:$16 sps:$4 sm:$0xff]  }
  0x27   :  { %1703 = vmatpush1.bf16.msra.mxu1 %v3352_v11  ;;  %1663 = vmatprep.subr.bf16.mxu0 %v3353_v12  ;;  %v3367_v21 = vld [vmem:[#allocation2 + $0x244] ss:$16 sps:$4 sm:$0xff]   ;;  %v3370_v23 = vld [vmem:[#allocation2 + $0x240] ss:$16 sps:$4 sm:$0xff]  }
  0x28   :  { %1704 = vmatprep.subr.bf16.mxu1 %v3355_v13  ;;  %v3371_v24 = vld [vmem:[#allocation2 + $0x24] ss:$16 sps:$4 sm:$0xff]   ;;  %v3375_v26 = vld [vmem:[#allocation2 + $0x20] ss:$16 sps:$4 sm:$0xff]  }
  0x29   :  { %v3373_v25 = vld [vmem:[#allocation2 + $0x224] ss:$16 sps:$4 sm:$0xff]   ;;  %v3376_v27 = vld [vmem:[#allocation2 + $0x220] ss:$16 sps:$4 sm:$0xff]  }
  0x2a   :  { %1664 = vmatpush1.bf16.msra.mxu0 %v3357_v14  ;;  %v3377_v28 = vld [vmem:[#allocation2 + $0x4] ss:$16 sps:$4 sm:$0xff]   ;;  %v3381_v30 = vld [vmem:[#allocation2] ss:$16 sps:$4 sm:$0xff]  }
  0x2b   :  { %1705 = vmatpush1.bf16.msra.mxu1 %v3358_v15  ;;  %1665 = vmatprep.subr.bf16.mxu0 %v3359_v16  ;;  %v3379_v29 = vld [vmem:[#allocation2 + $0x204] ss:$16 sps:$4 sm:$0xff]   ;;  %v3382_v31 = vld [vmem:[#allocation2 + $0x200] ss:$16 sps:$4 sm:$0xff]  }
  0x2c   :  { %1706 = vmatprep.subr.bf16.mxu1 %v3361_v17  ;;  %v3383_v32 = vld [vmem:[#allocation2 + $0x1e4] ss:$16 sps:$4 sm:$0xff]   ;;  %v3387_v34 = vld [vmem:[#allocation2 + $0x1e0] ss:$16 sps:$4 sm:$0xff]  }
  0x2d   :  { %v3385_v33 = vld [vmem:[#allocation2 + $0x3e4] ss:$16 sps:$4 sm:$0xff]   ;;  %v3388_v35 = vld [vmem:[#allocation2 + $0x3e0] ss:$16 sps:$4 sm:$0xff]  }
  0x2e   :  { %1666 = vmatpush1.bf16.msra.mxu0 %v3363_v18  ;;  %v3389_v36 = vld [vmem:[#allocation2 + $0x1c4] ss:$16 sps:$4 sm:$0xff]   ;;  %v3393_v38 = vld [vmem:[#allocation2 + $0x1c0] ss:$16 sps:$4 sm:$0xff]  }
  0x2f   :  { %1707 = vmatpush1.bf16.msra.mxu1 %v3364_v19  ;;  %1667 = vmatprep.subr.bf16.mxu0 %v3365_v20  ;;  %v3391_v37 = vld [vmem:[#allocation2 + $0x3c4] ss:$16 sps:$4 sm:$0xff]   ;;  %v3394_v39 = vld [vmem:[#allocation2 + $0x3c0] ss:$16 sps:$4 sm:$0xff]  }
  0x30   :  { %1708 = vmatprep.subr.bf16.mxu1 %v3367_v21  ;;  %v3395_v40 = vld [vmem:[#allocation2 + $0x1a4] ss:$16 sps:$4 sm:$0xff]   ;;  %v3399_v42 = vld [vmem:[#allocation2 + $0x1a0] ss:$16 sps:$4 sm:$0xff]  }
  0x31   :  { %v3397_v41 = vld [vmem:[#allocation2 + $0x3a4] ss:$16 sps:$4 sm:$0xff]   ;;  %v3400_v43 = vld [vmem:[#allocation2 + $0x3a0] ss:$16 sps:$4 sm:$0xff]  }
  0x32   :  { %1668 = vmatpush1.bf16.msra.mxu0 %v3369_v22  ;;  %v3401_v44 = vld [vmem:[#allocation2 + $0x184] ss:$16 sps:$4 sm:$0xff]   ;;  %v3405_v49 = vld [vmem:[#allocation2 + $0x180] ss:$16 sps:$4 sm:$0xff]  }
  0x33   :  { %1709 = vmatpush1.bf16.msra.mxu1 %v3370_v23  ;;  %1669 = vmatprep.subr.bf16.mxu0 %v3371_v24  ;;  %v3403_v45 = vld [vmem:[#allocation2 + $0x384] ss:$16 sps:$4 sm:$0xff]   ;;  %v3406_v50 = vld [vmem:[#allocation2 + $0x380] ss:$16 sps:$4 sm:$0xff]  }
  0x34   :  { %1710 = vmatprep.subr.bf16.mxu1 %v3373_v25  ;;  %v67_v46 = vld [vmem:[%s4193_s0] sm:$0xff] }
  0x35   :  { %v3976_v47 = vcombine.high %v67_v46, %v67_v46  ;;  %v3407_v52 = vld [vmem:[#allocation2 + $0x164] ss:$16 sps:$4 sm:$0xff]   ;;  %v3411_v54 = vld [vmem:[#allocation2 + $0x160] ss:$16 sps:$4 sm:$0xff]   ;;  %v3985_v6 = vcombine.low %v67_v46, %v67_v46 }
  0x36   :  { %1670 = vmatpush1.bf16.msra.mxu0 %v3375_v26  ;;  %v3409_v53 = vld [vmem:[#allocation2 + $0x364] ss:$16 sps:$4 sm:$0xff]   ;;  %v3412_v55 = vld [vmem:[#allocation2 + $0x360] ss:$16 sps:$4 sm:$0xff]  }
  0x37   :  { %1711 = vmatpush1.bf16.msra.mxu1 %v3376_v27  ;;  %1671 = vmatprep.subr.bf16.mxu0 %v3377_v28  ;;  %v3413_v56 = vld [vmem:[#allocation2 + $0x144] ss:$16 sps:$4 sm:$0xff]   ;;  %v3417_v58 = vld [vmem:[#allocation2 + $0x140] ss:$16 sps:$4 sm:$0xff]  }
  0x38   :  { %1712 = vmatprep.subr.bf16.mxu1 %v3379_v29  ;;  %1689 = vmatprep.mubr.bf16.mxu0 %v3976_v47  ;;  %v3415_v57 = vld [vmem:[#allocation2 + $0x344] ss:$16 sps:$4 sm:$0xff]   ;;  %v3418_v59 = vld [vmem:[#allocation2 + $0x340] ss:$16 sps:$4 sm:$0xff]  }
  0x39   :  { %v3419_v60 = vld [vmem:[#allocation2 + $0x124] ss:$16 sps:$4 sm:$0xff]   ;;  %v3423_v62 = vld [vmem:[#allocation2 + $0x120] ss:$16 sps:$4 sm:$0xff]  }
  0x3a   :  { %1672 = vmatpush1.bf16.msra.mxu0 %v3381_v30  ;;  %v3421_v61 = vld [vmem:[#allocation2 + $0x324] ss:$16 sps:$4 sm:$0xff]   ;;  %v3424_v63 = vld [vmem:[#allocation2 + $0x320] ss:$16 sps:$4 sm:$0xff]  }
  0x3b   :  { %1713 = vmatpush1.bf16.msra.mxu1 %v3382_v31  ;;  %1673 = vmatprep.subr.bf16.mxu0 %v3383_v32  ;;  %v3425_v0 = vld [vmem:[#allocation2 + $0x104] ss:$16 sps:$4 sm:$0xff]   ;;  %v3429_v2 = vld [vmem:[#allocation2 + $0x100] ss:$16 sps:$4 sm:$0xff]  }
  0x3c   :  { %1714 = vmatprep.subr.bf16.mxu1 %v3385_v33  ;;  %v3427_v1 = vld [vmem:[#allocation2 + $0x304] ss:$16 sps:$4 sm:$0xff]   ;;  %v3430_v3 = vld [vmem:[#allocation2 + $0x300] ss:$16 sps:$4 sm:$0xff]   ;;  %v3999_v33 = vld [vmem:[%s4193_s0 + $0x18] sm:$0xff] }
  0x3d   :  { %v3437_v4 = vld [vmem:[#allocation2 + $0x4e4] ss:$16 sps:$4 sm:$0xff]   ;;  %v3435_v8 = vld [vmem:[#allocation2 + $0x4e0] ss:$16 sps:$4 sm:$0xff]  }
  0x3e   :  { %1674 = vmatpush2.bf16.msra.mxu0 %v3387_v34  ;;  %v3440_v5 = vld [vmem:[#allocation2 + $0x6e4] ss:$16 sps:$4 sm:$0xff]   ;;  %v3438_v9 = vld [vmem:[#allocation2 + $0x6e0] ss:$16 sps:$4 sm:$0xff]  }
  0x3f   :  { %1715 = vmatpush2.bf16.msra.mxu1 %v3388_v35  ;;  %1675 = vmatprep.subr.bf16.mxu0 %v3389_v36  ;;  %v3443_v10 = vld [vmem:[#allocation2 + $0x4c4] ss:$16 sps:$4 sm:$0xff]   ;;  %v3441_v12 = vld [vmem:[#allocation2 + $0x4c0] ss:$16 sps:$4 sm:$0xff]  }
  0x40   :  { %1716 = vmatprep.subr.bf16.mxu1 %v3391_v37  ;;  %v3446_v11 = vld [vmem:[#allocation2 + $0x6c4] ss:$16 sps:$4 sm:$0xff]   ;;  %v3444_v13 = vld [vmem:[#allocation2 + $0x6c0] ss:$16 sps:$4 sm:$0xff]   ;;  %v4007_v37 = vcombine.high %v3999_v33, %v3999_v33 }
  0x41   :  { %v3449_v14 = vld [vmem:[#allocation2 + $0x4a4] ss:$16 sps:$4 sm:$0xff]   ;;  %v3447_v16 = vld [vmem:[#allocation2 + $0x4a0] ss:$16 sps:$4 sm:$0xff]  }
  0x42   :  { %1676 = vmatpush2.bf16.msra.mxu0 %v3393_v38  ;;  %v3452_v15 = vld [vmem:[#allocation2 + $0x6a4] ss:$16 sps:$4 sm:$0xff]   ;;  %v3450_v17 = vld [vmem:[#allocation2 + $0x6a0] ss:$16 sps:$4 sm:$0xff]  }
  0x43   :  { %1717 = vmatpush2.bf16.msra.mxu1 %v3394_v39  ;;  %1677 = vmatprep.subr.bf16.mxu0 %v3395_v40  ;;  %v3455_v18 = vld [vmem:[#allocation2 + $0x484] ss:$16 sps:$4 sm:$0xff]   ;;  %v3453_v20 = vld [vmem:[#allocation2 + $0x480] ss:$16 sps:$4 sm:$0xff]  }
  0x44   :  { %1718 = vmatprep.subr.bf16.mxu1 %v3397_v41  ;;  %v3458_v19 = vld [vmem:[#allocation2 + $0x684] ss:$16 sps:$4 sm:$0xff]   ;;  %v3456_v21 = vld [vmem:[#allocation2 + $0x680] ss:$16 sps:$4 sm:$0xff]  }
  0x45   :  { %v3461_v22 = vld [vmem:[#allocation2 + $0x464] ss:$16 sps:$4 sm:$0xff]   ;;  %v3459_v24 = vld [vmem:[#allocation2 + $0x460] ss:$16 sps:$4 sm:$0xff]  }
  0x46   :  { %1678 = vmatpush2.bf16.msra.mxu0 %v3399_v42  ;;  %v3464_v23 = vld [vmem:[#allocation2 + $0x664] ss:$16 sps:$4 sm:$0xff]   ;;  %v3462_v25 = vld [vmem:[#allocation2 + $0x660] ss:$16 sps:$4 sm:$0xff]  }
  0x47   :  { %1719 = vmatpush2.bf16.msra.mxu1 %v3400_v43  ;;  %1679 = vmatprep.subr.bf16.mxu0 %v3401_v44  ;;  %v3467_v26 = vld [vmem:[#allocation2 + $0x444] ss:$16 sps:$4 sm:$0xff]   ;;  %v3465_v28 = vld [vmem:[#allocation2 + $0x440] ss:$16 sps:$4 sm:$0xff]  }
  0x48   :  { %1720 = vmatprep.subr.bf16.mxu1 %v3403_v45  ;;  %v3470_v27 = vld [vmem:[#allocation2 + $0x644] ss:$16 sps:$4 sm:$0xff]   ;;  %v3468_v29 = vld [vmem:[#allocation2 + $0x640] ss:$16 sps:$4 sm:$0xff]  }
  0x49   :  { %v3473_v30 = vld [vmem:[#allocation2 + $0x424] ss:$16 sps:$4 sm:$0xff]   ;;  %v3471_v34 = vld [vmem:[#allocation2 + $0x420] ss:$16 sps:$4 sm:$0xff]  }
  0x4a   :  { %1680 = vmatpush2.bf16.msra.mxu0 %v3405_v49  ;;  %v3476_v31 = vld [vmem:[#allocation2 + $0x624] ss:$16 sps:$4 sm:$0xff]   ;;  %v3474_v35 = vld [vmem:[#allocation2 + $0x620] ss:$16 sps:$4 sm:$0xff]  }
  0x4b   :  { %1721 = vmatpush2.bf16.msra.mxu1 %v3406_v50  ;;  %1681 = vmatprep.subr.bf16.mxu0 %v3407_v52  ;;  %v3994_v32 = vld [vmem:[%s4193_s0 + $0x10] sm:$0xff] }
  0x4c   :  { %1722 = vmatprep.subr.bf16.mxu1 %v3409_v53  ;;  %v4003_v36 = vcombine.high %v3994_v32, %v3994_v32  ;;  %v3479_v38 = vld [vmem:[#allocation2 + $0x404] ss:$16 sps:$4 sm:$0xff]   ;;  %v3477_v40 = vld [vmem:[#allocation2 + $0x400] ss:$16 sps:$4 sm:$0xff]  }
  0x4d   :  { %v3482_v39 = vld [vmem:[#allocation2 + $0x604] ss:$16 sps:$4 sm:$0xff]   ;;  %v3480_v41 = vld [vmem:[#allocation2 + $0x600] ss:$16 sps:$4 sm:$0xff]  }
  0x4e   :  { %1682 = vmatpush2.bf16.msra.mxu0 %v3411_v54  ;;  %v3485_v42 = vld [vmem:[#allocation2 + $0x5e4] ss:$16 sps:$4 sm:$0xff]   ;;  %v3483_v44 = vld [vmem:[#allocation2 + $0x5e0] ss:$16 sps:$4 sm:$0xff]  }
  0x4f   :  { %1723 = vmatpush2.bf16.msra.mxu1 %v3412_v55  ;;  %1683 = vmatprep.subr.bf16.mxu0 %v3413_v56  ;;  %v3488_v43 = vld [vmem:[#allocation2 + $0x7e4] ss:$16 sps:$4 sm:$0xff]   ;;  %v3486_v45 = vld [vmem:[#allocation2 + $0x7e0] ss:$16 sps:$4 sm:$0xff]  }
  0x50   :  { %1724 = vmatprep.subr.bf16.mxu1 %v3415_v57  ;;  %v3491_v46 = vld [vmem:[#allocation2 + $0x5c4] ss:$16 sps:$4 sm:$0xff]   ;;  %v3489_v49 = vld [vmem:[#allocation2 + $0x5c0] ss:$16 sps:$4 sm:$0xff]  }
  0x51   :  { %v3494_v48 = vld [vmem:[#allocation2 + $0x7c4] ss:$16 sps:$4 sm:$0xff]   ;;  %v3492_v50 = vld [vmem:[#allocation2 + $0x7c0] ss:$16 sps:$4 sm:$0xff]  }
  0x52   :  { %1684 = vmatpush2.bf16.msra.mxu0 %v3417_v58  ;;  %v3497_v52 = vld [vmem:[#allocation2 + $0x5a4] ss:$16 sps:$4 sm:$0xff]   ;;  %v3495_v54 = vld [vmem:[#allocation2 + $0x5a0] ss:$16 sps:$4 sm:$0xff]  }
  0x53   :  { %1725 = vmatpush2.bf16.msra.mxu1 %v3418_v59  ;;  %1685 = vmatprep.subr.bf16.mxu0 %v3419_v60  ;;  %v3500_v53 = vld [vmem:[#allocation2 + $0x7a4] ss:$16 sps:$4 sm:$0xff]   ;;  %v3498_v55 = vld [vmem:[#allocation2 + $0x7a0] ss:$16 sps:$4 sm:$0xff]  }
  0x54   :  { %1726 = vmatprep.subr.bf16.mxu1 %v3421_v61  ;;  %v3503_v56 = vld [vmem:[#allocation2 + $0x584] ss:$16 sps:$4 sm:$0xff]   ;;  %v3501_v58 = vld [vmem:[#allocation2 + $0x580] ss:$16 sps:$4 sm:$0xff]  }
  0x55   :  { %v3506_v57 = vld [vmem:[#allocation2 + $0x784] ss:$16 sps:$4 sm:$0xff]   ;;  %v3504_v59 = vld [vmem:[#allocation2 + $0x780] ss:$16 sps:$4 sm:$0xff]  }
  0x56   :  { %1686 = vmatpush2.bf16.msra.mxu0 %v3423_v62  ;;  %v3509_v60 = vld [vmem:[#allocation2 + $0x564] ss:$16 sps:$4 sm:$0xff]   ;;  %v3507_v62 = vld [vmem:[#allocation2 + $0x560] ss:$16 sps:$4 sm:$0xff]  }
  0x57   :  { %1727 = vmatpush2.bf16.msra.mxu1 %v3424_v63  ;;  %1687 = vmatprep.subr.bf16.mxu0 %v3425_v0  ;;  %v3512_v61 = vld [vmem:[#allocation2 + $0x764] ss:$16 sps:$4 sm:$0xff]   ;;  %v3510_v63 = vld [vmem:[#allocation2 + $0x760] ss:$16 sps:$4 sm:$0xff]  }
  0x58   :  { %1728 = vmatprep.subr.bf16.mxu1 %v3427_v1  ;;  %v3515_v0 = vld [vmem:[#allocation2 + $0x544] ss:$16 sps:$4 sm:$0xff]  }
  0x59   :  { %v3518_v1 = vld [vmem:[#allocation2 + $0x744] ss:$16 sps:$4 sm:$0xff]  }
  0x5a   :  { %1688 = vmatpush2.bf16.msra.mxu0 %v3429_v2  ;;  %v3513_v2 = vld [vmem:[#allocation2 + $0x540] ss:$16 sps:$4 sm:$0xff]  }
  0x5b   :  { %1729 = vmatpush2.bf16.msra.mxu1 %v3430_v3  ;;  %1739 = vmatprep.subr.bf16.mxu0 %v3437_v4  ;;  %v3516_v3 = vld [vmem:[#allocation2 + $0x740] ss:$16 sps:$4 sm:$0xff]   ;;  %v3521_v4 = vld [vmem:[#allocation2 + $0x524] ss:$16 sps:$4 sm:$0xff]  }
  0x5c   :  { %1780 = vmatprep.subr.bf16.mxu1 %v3440_v5  ;;  %v3524_v5 = vld [vmem:[#allocation2 + $0x724] ss:$16 sps:$4 sm:$0xff]  }
  0x5d   :  { %1690 = vmatmul.mubr.bf16.vlgmr.msra.gmra.mxu0 %v3985_v6 }
  0x5e   :  { %1731 = vmatmul.mubr.bf16.vlgmr.msra.gmra.mxu1 %v3987_v7  ;;  %1740 = vmatpush1.bf16.msra.mxu0 %v3435_v8  ;;  %v3519_v8 = vld [vmem:[#allocation2 + $0x520] ss:$16 sps:$4 sm:$0xff]  }
  0x5f   :  { %1781 = vmatpush1.bf16.msra.mxu1 %v3438_v9  ;;  %1741 = vmatprep.subr.bf16.mxu0 %v3443_v10  ;;  %v3522_v9 = vld [vmem:[#allocation2 + $0x720] ss:$16 sps:$4 sm:$0xff]   ;;  %v3527_v10 = vld [vmem:[#allocation2 + $0x504] ss:$16 sps:$4 sm:$0xff]  }
  0x60   :  { %1782 = vmatprep.subr.bf16.mxu1 %v3446_v11  ;;  %1771 = vmatprep.mubr.bf16.mxu0 %v4003_v36  ;;  %v3530_v11 = vld [vmem:[#allocation2 + $0x704] ss:$16 sps:$4 sm:$0xff]  }
  0x61   :  { %1812 = vmatprep.mubr.bf16.mxu1 %v4007_v37 }
  0x62   :  { %1742 = vmatpush1.bf16.msra.mxu0 %v3441_v12  ;;  %v3525_v12 = vld [vmem:[#allocation2 + $0x500] ss:$16 sps:$4 sm:$0xff]  }
  0x63   :  { %1783 = vmatpush1.bf16.msra.mxu1 %v3444_v13  ;;  %1743 = vmatprep.subr.bf16.mxu0 %v3449_v14  ;;  %v3528_v13 = vld [vmem:[#allocation2 + $0x700] ss:$16 sps:$4 sm:$0xff]   ;;  %v3537_v14 = vld [vmem:[#allocation2 + $0xec] ss:$16 sps:$4 sm:$0xff]  }
  0x64   :  { %1784 = vmatprep.subr.bf16.mxu1 %v3452_v15  ;;  %v3540_v15 = vld [vmem:[#allocation2 + $0x2ec] ss:$16 sps:$4 sm:$0xff]  }
  0x66   :  { %1744 = vmatpush1.bf16.msra.mxu0 %v3447_v16  ;;  %v4013_v16 = vcombine.low %v3994_v32, %v3994_v32  ;;  %v3561_v32 = vld [vmem:[#allocation2 + $0x6c] ss:$16 sps:$4 sm:$0xff]  }
  0x67   :  { %1785 = vmatpush1.bf16.msra.mxu1 %v3450_v17  ;;  %1745 = vmatprep.subr.bf16.mxu0 %v3455_v18  ;;  %v4017_v17 = vcombine.low %v3999_v33, %v3999_v33  ;;  %v3535_v18 = vld [vmem:[#allocation2 + $0xe8] ss:$16 sps:$4 sm:$0xff]   ;;  %v3564_v33 = vld [vmem:[#allocation2 + $0x26c] ss:$16 sps:$4 sm:$0xff]  }
  0x68   :  { %1786 = vmatprep.subr.bf16.mxu1 %v3458_v19  ;;  %v3538_v19 = vld [vmem:[#allocation2 + $0x2e8] ss:$16 sps:$4 sm:$0xff]  }
  0x6a   :  { %1746 = vmatpush1.bf16.msra.mxu0 %v3453_v20  ;;  %v3543_v20 = vld [vmem:[#allocation2 + $0xcc] ss:$16 sps:$4 sm:$0xff]  }
  0x6b   :  { %1787 = vmatpush1.bf16.msra.mxu1 %v3456_v21  ;;  %1747 = vmatprep.subr.bf16.mxu0 %v3461_v22  ;;  %v3546_v21 = vld [vmem:[#allocation2 + $0x2cc] ss:$16 sps:$4 sm:$0xff]   ;;  %v3541_v22 = vld [vmem:[#allocation2 + $0xc8] ss:$16 sps:$4 sm:$0xff]  }
  0x6c   :  { %1788 = vmatprep.subr.bf16.mxu1 %v3464_v23  ;;  %v3544_v23 = vld [vmem:[#allocation2 + $0x2c8] ss:$16 sps:$4 sm:$0xff]  }
  0x6e   :  { %1748 = vmatpush1.bf16.msra.mxu0 %v3459_v24  ;;  %v3549_v24 = vld [vmem:[#allocation2 + $0xac] ss:$16 sps:$4 sm:$0xff]  }
  0x6f   :  { %1789 = vmatpush1.bf16.msra.mxu1 %v3462_v25  ;;  %1749 = vmatprep.subr.bf16.mxu0 %v3467_v26  ;;  %v3552_v25 = vld [vmem:[#allocation2 + $0x2ac] ss:$16 sps:$4 sm:$0xff]   ;;  %v3547_v26 = vld [vmem:[#allocation2 + $0xa8] ss:$16 sps:$4 sm:$0xff]  }
  0x70   :  { %1790 = vmatprep.subr.bf16.mxu1 %v3470_v27  ;;  %v3550_v27 = vld [vmem:[#allocation2 + $0x2a8] ss:$16 sps:$4 sm:$0xff]  }
  0x72   :  { %1750 = vmatpush1.bf16.msra.mxu0 %v3465_v28  ;;  %v3555_v28 = vld [vmem:[#allocation2 + $0x8c] ss:$16 sps:$4 sm:$0xff]  }
  0x73   :  { %1791 = vmatpush1.bf16.msra.mxu1 %v3468_v29  ;;  %1751 = vmatprep.subr.bf16.mxu0 %v3473_v30  ;;  %v3558_v29 = vld [vmem:[#allocation2 + $0x28c] ss:$16 sps:$4 sm:$0xff]   ;;  %v3553_v30 = vld [vmem:[#allocation2 + $0x88] ss:$16 sps:$4 sm:$0xff]  }
  0x74   :  { %1792 = vmatprep.subr.bf16.mxu1 %v3476_v31  ;;  %v3556_v31 = vld [vmem:[#allocation2 + $0x288] ss:$16 sps:$4 sm:$0xff]  }
  0x76   :  { %1752 = vmatpush1.bf16.msra.mxu0 %v3471_v34  ;;  %v3559_v34 = vld [vmem:[#allocation2 + $0x68] ss:$16 sps:$4 sm:$0xff]  }
  0x77   :  { %1793 = vmatpush1.bf16.msra.mxu1 %v3474_v35  ;;  %1753 = vmatprep.subr.bf16.mxu0 %v3479_v38  ;;  %v3570_v35 = vld [vmem:[#allocation2 + $0x24c] ss:$16 sps:$4 sm:$0xff]   ;;  %v3565_v38 = vld [vmem:[#allocation2 + $0x48] ss:$16 sps:$4 sm:$0xff]  }
  0x78   :  { %1794 = vmatprep.subr.bf16.mxu1 %v3482_v39  ;;  %v3568_v39 = vld [vmem:[#allocation2 + $0x248] ss:$16 sps:$4 sm:$0xff]  }
  0x7a   :  { %1754 = vmatpush1.bf16.msra.mxu0 %v3477_v40  ;;  %v3573_v40 = vld [vmem:[#allocation2 + $0x2c] ss:$16 sps:$4 sm:$0xff]  }
  0x7b   :  { %1795 = vmatpush1.bf16.msra.mxu1 %v3480_v41  ;;  %1755 = vmatprep.subr.bf16.mxu0 %v3485_v42  ;;  %v3576_v41 = vld [vmem:[#allocation2 + $0x22c] ss:$16 sps:$4 sm:$0xff]   ;;  %v3571_v42 = vld [vmem:[#allocation2 + $0x28] ss:$16 sps:$4 sm:$0xff]  }
  0x7c   :  { %1796 = vmatprep.subr.bf16.mxu1 %v3488_v43  ;;  %v3574_v43 = vld [vmem:[#allocation2 + $0x228] ss:$16 sps:$4 sm:$0xff]  }
  0x7e   :  { %1756 = vmatpush2.bf16.msra.mxu0 %v3483_v44  ;;  %v3579_v44 = vld [vmem:[#allocation2 + $0xc] ss:$16 sps:$4 sm:$0xff]  }
  0x7f   :  { %1797 = vmatpush2.bf16.msra.mxu1 %v3486_v45  ;;  %1757 = vmatprep.subr.bf16.mxu0 %v3491_v46  ;;  %v3582_v45 = vld [vmem:[#allocation2 + $0x20c] ss:$16 sps:$4 sm:$0xff]   ;;  %v3577_v46 = vld [vmem:[#allocation2 + $0x8] ss:$16 sps:$4 sm:$0xff]  }
  0x80   :  { %1798 = vmatprep.subr.bf16.mxu1 %v3494_v48  ;;  %v3580_v48 = vld [vmem:[#allocation2 + $0x208] ss:$16 sps:$4 sm:$0xff]  }
  0x82   :  { %1758 = vmatpush2.bf16.msra.mxu0 %v3489_v49  ;;  %v3585_v49 = vld [vmem:[#allocation2 + $0x1ec] ss:$16 sps:$4 sm:$0xff]  }
  0x83   :  { %1799 = vmatpush2.bf16.msra.mxu1 %v3492_v50  ;;  %1759 = vmatprep.subr.bf16.mxu0 %v3497_v52  ;;  %v3588_v50 = vld [vmem:[#allocation2 + $0x3ec] ss:$16 sps:$4 sm:$0xff]   ;;  %v3583_v52 = vld [vmem:[#allocation2 + $0x1e8] ss:$16 sps:$4 sm:$0xff]  }
  0x84   :  { %1800 = vmatprep.subr.bf16.mxu1 %v3500_v53  ;;  %v3586_v53 = vld [vmem:[#allocation2 + $0x3e8] ss:$16 sps:$4 sm:$0xff]  }
  0x86   :  { %1760 = vmatpush2.bf16.msra.mxu0 %v3495_v54  ;;  %v3591_v54 = vld [vmem:[#allocation2 + $0x1cc] ss:$16 sps:$4 sm:$0xff]  }
  0x87   :  { %1801 = vmatpush2.bf16.msra.mxu1 %v3498_v55  ;;  %1761 = vmatprep.subr.bf16.mxu0 %v3503_v56  ;;  %v3594_v55 = vld [vmem:[#allocation2 + $0x3cc] ss:$16 sps:$4 sm:$0xff]   ;;  %v3589_v56 = vld [vmem:[#allocation2 + $0x1c8] ss:$16 sps:$4 sm:$0xff]  }
  0x88   :  { %1802 = vmatprep.subr.bf16.mxu1 %v3506_v57  ;;  %v3592_v57 = vld [vmem:[#allocation2 + $0x3c8] ss:$16 sps:$4 sm:$0xff]  }
  0x8a   :  { %1762 = vmatpush2.bf16.msra.mxu0 %v3501_v58  ;;  %v3597_v58 = vld [vmem:[#allocation2 + $0x1ac] ss:$16 sps:$4 sm:$0xff]  }
  0x8b   :  { %1803 = vmatpush2.bf16.msra.mxu1 %v3504_v59  ;;  %1763 = vmatprep.subr.bf16.mxu0 %v3509_v60  ;;  %v3600_v59 = vld [vmem:[#allocation2 + $0x3ac] ss:$16 sps:$4 sm:$0xff]   ;;  %v3595_v60 = vld [vmem:[#allocation2 + $0x1a8] ss:$16 sps:$4 sm:$0xff]  }
  0x8c   :  { %1804 = vmatprep.subr.bf16.mxu1 %v3512_v61  ;;  %v3598_v61 = vld [vmem:[#allocation2 + $0x3a8] ss:$16 sps:$4 sm:$0xff]  }
  0x8e   :  { %1764 = vmatpush2.bf16.msra.mxu0 %v3507_v62  ;;  %v3603_v62 = vld [vmem:[#allocation2 + $0x18c] ss:$16 sps:$4 sm:$0xff]  }
  0x8f   :  { %1805 = vmatpush2.bf16.msra.mxu1 %v3510_v63  ;;  %1765 = vmatprep.subr.bf16.mxu0 %v3515_v0  ;;  %v3606_v63 = vld [vmem:[#allocation2 + $0x38c] ss:$16 sps:$4 sm:$0xff]   ;;  %v3601_v0 = vld [vmem:[#allocation2 + $0x188] ss:$16 sps:$4 sm:$0xff]  }
  0x90   :  { %1806 = vmatprep.subr.bf16.mxu1 %v3518_v1  ;;  %v3604_v1 = vld [vmem:[#allocation2 + $0x388] ss:$16 sps:$4 sm:$0xff]  }
  0x92   :  { %1766 = vmatpush2.bf16.msra.mxu0 %v3513_v2  ;;  %v3609_v2 = vld [vmem:[#allocation2 + $0x16c] ss:$16 sps:$4 sm:$0xff]  }
  0x93   :  { %1807 = vmatpush2.bf16.msra.mxu1 %v3516_v3  ;;  %1767 = vmatprep.subr.bf16.mxu0 %v3521_v4  ;;  %v3612_v3 = vld [vmem:[#allocation2 + $0x36c] ss:$16 sps:$4 sm:$0xff]   ;;  %v3607_v4 = vld [vmem:[#allocation2 + $0x168] ss:$16 sps:$4 sm:$0xff]  }
  0x94   :  { %1808 = vmatprep.subr.bf16.mxu1 %v3524_v5  ;;  %v3610_v5 = vld [vmem:[#allocation2 + $0x368] ss:$16 sps:$4 sm:$0xff]  }
  0x96   :  { %1768 = vmatpush2.bf16.msra.mxu0 %v3519_v8  ;;  %v3615_v8 = vld [vmem:[#allocation2 + $0x14c] ss:$16 sps:$4 sm:$0xff]  }
  0x97   :  { %1809 = vmatpush2.bf16.msra.mxu1 %v3522_v9  ;;  %1769 = vmatprep.subr.bf16.mxu0 %v3527_v10  ;;  %v3618_v9 = vld [vmem:[#allocation2 + $0x34c] ss:$16 sps:$4 sm:$0xff]   ;;  %v3613_v10 = vld [vmem:[#allocation2 + $0x148] ss:$16 sps:$4 sm:$0xff]  }
  0x98   :  { %1810 = vmatprep.subr.bf16.mxu1 %v3530_v11  ;;  %v3616_v11 = vld [vmem:[#allocation2 + $0x348] ss:$16 sps:$4 sm:$0xff]  }
  0x9a   :  { %1770 = vmatpush2.bf16.msra.mxu0 %v3525_v12  ;;  %v3621_v12 = vld [vmem:[#allocation2 + $0x12c] ss:$16 sps:$4 sm:$0xff]  }
  0x9b   :  { %1811 = vmatpush2.bf16.msra.mxu1 %v3528_v13  ;;  %1821 = vmatprep.subr.bf16.mxu0 %v3537_v14  ;;  %v3624_v13 = vld [vmem:[#allocation2 + $0x32c] ss:$16 sps:$4 sm:$0xff]   ;;  %v3619_v14 = vld [vmem:[#allocation2 + $0x128] ss:$16 sps:$4 sm:$0xff]  }
  0x9c   :  { %1862 = vmatprep.subr.bf16.mxu1 %v3540_v15  ;;  %v3622_v15 = vld [vmem:[#allocation2 + $0x328] ss:$16 sps:$4 sm:$0xff]  }
  0x9d   :  { %1772 = vmatmul.mubr.bf16.vlgmr.msra.gmra.mxu0 %v4013_v16 }
  0x9e   :  { %1813 = vmatmul.mubr.bf16.vlgmr.msra.gmra.mxu1 %v4017_v17  ;;  %1822 = vmatpush1.bf16.msra.mxu0 %v3535_v18  ;;  %v3627_v18 = vld [vmem:[#allocation2 + $0x10c] ss:$16 sps:$4 sm:$0xff]  }
  0x9f   :  { %1863 = vmatpush1.bf16.msra.mxu1 %v3538_v19  ;;  %1823 = vmatprep.subr.bf16.mxu0 %v3543_v20  ;;  %v3630_v19 = vld [vmem:[#allocation2 + $0x30c] ss:$16 sps:$4 sm:$0xff]   ;;  %v3625_v20 = vld [vmem:[#allocation2 + $0x108] ss:$16 sps:$4 sm:$0xff]  }
  0xa0   :  { %1864 = vmatprep.subr.bf16.mxu1 %v3546_v21  ;;  %1853 = vmatprep.mubr.bf16.mxu0 %v3976_v47  ;;  %v3562_v47 = vld [vmem:[#allocation2 + $0x268] ss:$16 sps:$4 sm:$0xff]  }
  0xa1   :  { %1894 = vmatprep.mubr.bf16.mxu1 %v3981_v51  ;;  %v3567_v51 = vld [vmem:[#allocation2 + $0x4c] ss:$16 sps:$4 sm:$0xff]   ;;  %v3628_v21 = vld [vmem:[#allocation2 + $0x308] ss:$16 sps:$4 sm:$0xff]  }
  0xa2   :  { %1824 = vmatpush1.bf16.msra.mxu0 %v3541_v22  ;;  %v3633_v22 = vld [vmem:[#allocation2 + $0x4ec] ss:$16 sps:$4 sm:$0xff]  }
  0xa3   :  { %1865 = vmatpush1.bf16.msra.mxu1 %v3544_v23  ;;  %1825 = vmatprep.subr.bf16.mxu0 %v3549_v24  ;;  %v3636_v23 = vld [vmem:[#allocation2 + $0x6ec] ss:$16 sps:$4 sm:$0xff]   ;;  %v3631_v24 = vld [vmem:[#allocation2 + $0x4e8] ss:$16 sps:$4 sm:$0xff]  }
  0xa4   :  { %1866 = vmatprep.subr.bf16.mxu1 %v3552_v25  ;;  %v3634_v25 = vld [vmem:[#allocation2 + $0x6e8] ss:$16 sps:$4 sm:$0xff]  }
  0xa6   :  { %1826 = vmatpush1.bf16.msra.mxu0 %v3547_v26  ;;  %v3639_v26 = vld [vmem:[#allocation2 + $0x4cc] ss:$16 sps:$4 sm:$0xff]  }
  0xa7   :  { %1867 = vmatpush1.bf16.msra.mxu1 %v3550_v27  ;;  %1827 = vmatprep.subr.bf16.mxu0 %v3555_v28  ;;  %v3642_v27 = vld [vmem:[#allocation2 + $0x6cc] ss:$16 sps:$4 sm:$0xff]   ;;  %v3637_v28 = vld [vmem:[#allocation2 + $0x4c8] ss:$16 sps:$4 sm:$0xff]  }
  0xa8   :  { %1868 = vmatprep.subr.bf16.mxu1 %v3558_v29  ;;  %v3640_v29 = vld [vmem:[#allocation2 + $0x6c8] ss:$16 sps:$4 sm:$0xff]  }
  0xaa   :  { %1828 = vmatpush1.bf16.msra.mxu0 %v3553_v30  ;;  %v3645_v30 = vld [vmem:[#allocation2 + $0x4ac] ss:$16 sps:$4 sm:$0xff]  }
  0xab   :  { %1869 = vmatpush1.bf16.msra.mxu1 %v3556_v31  ;;  %1829 = vmatprep.subr.bf16.mxu0 %v3561_v32  ;;  %v3648_v31 = vld [vmem:[#allocation2 + $0x6ac] ss:$16 sps:$4 sm:$0xff]   ;;  %v3643_v32 = vld [vmem:[#allocation2 + $0x4a8] ss:$16 sps:$4 sm:$0xff]  }
  0xac   :  { %1870 = vmatprep.subr.bf16.mxu1 %v3564_v33  ;;  %v3646_v33 = vld [vmem:[#allocation2 + $0x6a8] ss:$16 sps:$4 sm:$0xff]  }
  0xae   :  { %1830 = vmatpush1.bf16.msra.mxu0 %v3559_v34  ;;  %v3651_v34 = vld [vmem:[#allocation2 + $0x48c] ss:$16 sps:$4 sm:$0xff]  }
  0xaf   :  { %1871 = vmatpush1.bf16.msra.mxu1 %v3562_v47  ;;  %1831 = vmatprep.subr.bf16.mxu0 %v3567_v51  ;;  %v3649_v47 = vld [vmem:[#allocation2 + $0x488] ss:$16 sps:$4 sm:$0xff]   ;;  %v3657_v51 = vld [vmem:[#allocation2 + $0x46c] ss:$16 sps:$4 sm:$0xff]  }
  0xb0   :  { %1872 = vmatprep.subr.bf16.mxu1 %v3570_v35  ;;  %v3660_v35 = vld [vmem:[#allocation2 + $0x66c] ss:$16 sps:$4 sm:$0xff]  }
  0xb2   :  { %1832 = vmatpush1.bf16.msra.mxu0 %v3565_v38  ;;  %v3655_v38 = vld [vmem:[#allocation2 + $0x468] ss:$16 sps:$4 sm:$0xff]  }
  0xb3   :  { %1873 = vmatpush1.bf16.msra.mxu1 %v3568_v39  ;;  %1833 = vmatprep.subr.bf16.mxu0 %v3573_v40  ;;  %v3658_v39 = vld [vmem:[#allocation2 + $0x668] ss:$16 sps:$4 sm:$0xff]   ;;  %v3663_v40 = vld [vmem:[#allocation2 + $0x44c] ss:$16 sps:$4 sm:$0xff]  }
  0xb4   :  { %1874 = vmatprep.subr.bf16.mxu1 %v3576_v41  ;;  %v3664_v41 = vld [vmem:[#allocation2 + $0x648] ss:$16 sps:$4 sm:$0xff]  }
  0xb6   :  { %1834 = vmatpush1.bf16.msra.mxu0 %v3571_v42  ;;  %v3669_v42 = vld [vmem:[#allocation2 + $0x42c] ss:$16 sps:$4 sm:$0xff]  }
  0xb7   :  { %1875 = vmatpush1.bf16.msra.mxu1 %v3574_v43  ;;  %1835 = vmatprep.subr.bf16.mxu0 %v3579_v44  ;;  %v3672_v43 = vld [vmem:[#allocation2 + $0x62c] ss:$16 sps:$4 sm:$0xff]   ;;  %v3667_v44 = vld [vmem:[#allocation2 + $0x428] ss:$16 sps:$4 sm:$0xff]  }
  0xb8   :  { %1876 = vmatprep.subr.bf16.mxu1 %v3582_v45  ;;  %v3670_v45 = vld [vmem:[#allocation2 + $0x628] ss:$16 sps:$4 sm:$0xff]  }
  0xba   :  { %1836 = vmatpush1.bf16.msra.mxu0 %v3577_v46  ;;  %v3675_v46 = vld [vmem:[#allocation2 + $0x40c] ss:$16 sps:$4 sm:$0xff]  }
  0xbb   :  { %1877 = vmatpush1.bf16.msra.mxu1 %v3580_v48  ;;  %1837 = vmatprep.subr.bf16.mxu0 %v3585_v49  ;;  %v3678_v48 = vld [vmem:[#allocation2 + $0x60c] ss:$16 sps:$4 sm:$0xff]   ;;  %v3673_v49 = vld [vmem:[#allocation2 + $0x408] ss:$16 sps:$4 sm:$0xff]  }
  0xbc   :  { %1878 = vmatprep.subr.bf16.mxu1 %v3588_v50  ;;  %v3676_v50 = vld [vmem:[#allocation2 + $0x608] ss:$16 sps:$4 sm:$0xff]  }
  0xbe   :  { %1838 = vmatpush2.bf16.msra.mxu0 %v3583_v52  ;;  %v3681_v52 = vld [vmem:[#allocation2 + $0x5ec] ss:$16 sps:$4 sm:$0xff]  }
  0xbf   :  { %1879 = vmatpush2.bf16.msra.mxu1 %v3586_v53  ;;  %1839 = vmatprep.subr.bf16.mxu0 %v3591_v54  ;;  %v3684_v53 = vld [vmem:[#allocation2 + $0x7ec] ss:$16 sps:$4 sm:$0xff]   ;;  %v3679_v54 = vld [vmem:[#allocation2 + $0x5e8] ss:$16 sps:$4 sm:$0xff]  }
  0xc0   :  { %1880 = vmatprep.subr.bf16.mxu1 %v3594_v55  ;;  %v3682_v55 = vld [vmem:[#allocation2 + $0x7e8] ss:$16 sps:$4 sm:$0xff]  }
  0xc2   :  { %1840 = vmatpush2.bf16.msra.mxu0 %v3589_v56  ;;  %v3687_v56 = vld [vmem:[#allocation2 + $0x5cc] ss:$16 sps:$4 sm:$0xff]  }
  0xc3   :  { %1881 = vmatpush2.bf16.msra.mxu1 %v3592_v57  ;;  %1841 = vmatprep.subr.bf16.mxu0 %v3597_v58  ;;  %v3690_v57 = vld [vmem:[#allocation2 + $0x7cc] ss:$16 sps:$4 sm:$0xff]   ;;  %v3685_v58 = vld [vmem:[#allocation2 + $0x5c8] ss:$16 sps:$4 sm:$0xff]  }
  0xc4   :  { %1882 = vmatprep.subr.bf16.mxu1 %v3600_v59  ;;  %v3688_v59 = vld [vmem:[#allocation2 + $0x7c8] ss:$16 sps:$4 sm:$0xff]  }
  0xc6   :  { %1842 = vmatpush2.bf16.msra.mxu0 %v3595_v60  ;;  %v3693_v60 = vld [vmem:[#allocation2 + $0x5ac] ss:$16 sps:$4 sm:$0xff]  }
  0xc7   :  { %1883 = vmatpush2.bf16.msra.mxu1 %v3598_v61  ;;  %1843 = vmatprep.subr.bf16.mxu0 %v3603_v62  ;;  %v3696_v61 = vld [vmem:[#allocation2 + $0x7ac] ss:$16 sps:$4 sm:$0xff]   ;;  %v3691_v62 = vld [vmem:[#allocation2 + $0x5a8] ss:$16 sps:$4 sm:$0xff]  }
  0xc8   :  { %1884 = vmatprep.subr.bf16.mxu1 %v3606_v63  ;;  %v3694_v63 = vld [vmem:[#allocation2 + $0x7a8] ss:$16 sps:$4 sm:$0xff]  }
  0xca   :  { %1844 = vmatpush2.bf16.msra.mxu0 %v3601_v0  ;;  %v3699_v0 = vld [vmem:[#allocation2 + $0x58c] ss:$16 sps:$4 sm:$0xff]  }
  0xcb   :  { %1885 = vmatpush2.bf16.msra.mxu1 %v3604_v1  ;;  %1845 = vmatprep.subr.bf16.mxu0 %v3609_v2  ;;  %v3702_v1 = vld [vmem:[#allocation2 + $0x78c] ss:$16 sps:$4 sm:$0xff]   ;;  %v3697_v2 = vld [vmem:[#allocation2 + $0x588] ss:$16 sps:$4 sm:$0xff]  }
  0xcc   :  { %1886 = vmatprep.subr.bf16.mxu1 %v3612_v3  ;;  %v3700_v3 = vld [vmem:[#allocation2 + $0x788] ss:$16 sps:$4 sm:$0xff]  }
  0xce   :  { %1846 = vmatpush2.bf16.msra.mxu0 %v3607_v4  ;;  %v3705_v4 = vld [vmem:[#allocation2 + $0x56c] ss:$16 sps:$4 sm:$0xff]  }
  0xcf   :  { %1887 = vmatpush2.bf16.msra.mxu1 %v3610_v5  ;;  %1847 = vmatprep.subr.bf16.mxu0 %v3615_v8  ;;  %v3708_v5 = vld [vmem:[#allocation2 + $0x76c] ss:$16 sps:$4 sm:$0xff]   ;;  %v3703_v8 = vld [vmem:[#allocation2 + $0x568] ss:$16 sps:$4 sm:$0xff]  }
  0xd0   :  { %1888 = vmatprep.subr.bf16.mxu1 %v3618_v9  ;;  %v3706_v9 = vld [vmem:[#allocation2 + $0x768] ss:$16 sps:$4 sm:$0xff]  }
  0xd2   :  { %1848 = vmatpush2.bf16.msra.mxu0 %v3613_v10  ;;  %v3711_v10 = vld [vmem:[#allocation2 + $0x54c] ss:$16 sps:$4 sm:$0xff]  }
  0xd3   :  { %1889 = vmatpush2.bf16.msra.mxu1 %v3616_v11  ;;  %1849 = vmatprep.subr.bf16.mxu0 %v3621_v12  ;;  %v3714_v11 = vld [vmem:[#allocation2 + $0x74c] ss:$16 sps:$4 sm:$0xff]   ;;  %v3709_v12 = vld [vmem:[#allocation2 + $0x548] ss:$16 sps:$4 sm:$0xff]  }
  0xd4   :  { %1890 = vmatprep.subr.bf16.mxu1 %v3624_v13  ;;  %v3712_v13 = vld [vmem:[#allocation2 + $0x748] ss:$16 sps:$4 sm:$0xff]  }
  0xd6   :  { %1850 = vmatpush2.bf16.msra.mxu0 %v3619_v14  ;;  %v3717_v14 = vld [vmem:[#allocation2 + $0x52c] ss:$16 sps:$4 sm:$0xff]  }
  0xd7   :  { %1891 = vmatpush2.bf16.msra.mxu1 %v3622_v15  ;;  %1851 = vmatprep.subr.bf16.mxu0 %v3627_v18  ;;  %v3720_v15 = vld [vmem:[#allocation2 + $0x72c] ss:$16 sps:$4 sm:$0xff]   ;;  %v3715_v18 = vld [vmem:[#allocation2 + $0x528] ss:$16 sps:$4 sm:$0xff]  }
  0xd8   :  { %1892 = vmatprep.subr.bf16.mxu1 %v3630_v19  ;;  %v3718_v19 = vld [vmem:[#allocation2 + $0x728] ss:$16 sps:$4 sm:$0xff]  }
  0xda   :  { %1852 = vmatpush2.bf16.msra.mxu0 %v3625_v20  ;;  %v3723_v20 = vld [vmem:[#allocation2 + $0x50c] ss:$16 sps:$4 sm:$0xff]  }
  0xdb   :  { %1893 = vmatpush2.bf16.msra.mxu1 %v3628_v21  ;;  %1903 = vmatprep.subr.bf16.mxu0 %v3633_v22  ;;  %v3726_v21 = vld [vmem:[#allocation2 + $0x70c] ss:$16 sps:$4 sm:$0xff]   ;;  %v3721_v22 = vld [vmem:[#allocation2 + $0x508] ss:$16 sps:$4 sm:$0xff]  }
  0xdc   :  { %1944 = vmatprep.subr.bf16.mxu1 %v3636_v23  ;;  %v3724_v23 = vld [vmem:[#allocation2 + $0x708] ss:$16 sps:$4 sm:$0xff]  }
  0xdd   :  { %1854 = vmatmul.mubr.bf16.vlgmr.msra.gmra.mxu0 %v3985_v6  ;;  %v3654_v6 = vld [vmem:[#allocation2 + $0x68c] ss:$16 sps:$4 sm:$0xff]  }
  0xde   :  { %1895 = vmatmul.mubr.bf16.vlgmr.msra.gmra.mxu1 %v3987_v7  ;;  %1904 = vmatpush1.bf16.msra.mxu0 %v3631_v24  ;;  %v3652_v7 = vld [vmem:[#allocation2 + $0x688] ss:$16 sps:$4 sm:$0xff]   ;;  %v3729_v24 = vld [vmem:[#allocation4 + $0x74] ss:$8 sps:$4 sm:$0xff]  }
  0xdf   :  { %1945 = vmatpush1.bf16.msra.mxu1 %v3634_v25  ;;  %1905 = vmatprep.subr.bf16.mxu0 %v3639_v26  ;;  %v3727_v25 = vld [vmem:[#allocation4 + $0x70] ss:$8 sps:$4 sm:$0xff]   ;;  %v3732_v26 = vld [vmem:[#allocation4 + $0x64] ss:$8 sps:$4 sm:$0xff]  }
  0xe0   :  { %1946 = vmatprep.subr.bf16.mxu1 %v3642_v27  ;;  %1935 = vmatprep.mubr.bf16.mxu0 %v4003_v36  ;;  %v3666_v36 = vld [vmem:[#allocation2 + $0x64c] ss:$16 sps:$4 sm:$0xff]  }
  0xe1   :  { %1976 = vmatprep.mubr.bf16.mxu1 %v4007_v37  ;;  %v3661_v37 = vld [vmem:[#allocation2 + $0x448] ss:$16 sps:$4 sm:$0xff]  }
  0xe2   :  { %1906 = vmatpush1.bf16.msra.mxu0 %v3637_v28 }
  0xe3   :  { %1947 = vmatpush1.bf16.msra.mxu1 %v3640_v29  ;;  %1907 = vmatprep.subr.bf16.mxu0 %v3645_v30  ;;  %v3730_v29 = vld [vmem:[#allocation4 + $0x60] ss:$8 sps:$4 sm:$0xff]  }
  0xe4   :  { %1948 = vmatprep.subr.bf16.mxu1 %v3648_v31 }
  0xe6   :  { %1908 = vmatpush1.bf16.msra.mxu0 %v3643_v32  ;;  %v3735_v32 = vld [vmem:[#allocation4 + $0x54] ss:$8 sps:$4 sm:$0xff]  }
  0xe7   :  { %1949 = vmatpush1.bf16.msra.mxu1 %v3646_v33  ;;  %1909 = vmatprep.subr.bf16.mxu0 %v3651_v34 }
  0xe8   :  { %1950 = vmatprep.subr.bf16.mxu1 %v3654_v6  ;;  %v3733_v6 = vld [vmem:[#allocation4 + $0x50] ss:$8 sps:$4 sm:$0xff]  }
  0xea   :  { %1910 = vmatpush1.bf16.msra.mxu0 %v3649_v47 }
  0xeb   :  { %1951 = vmatpush1.bf16.msra.mxu1 %v3652_v7  ;;  %1911 = vmatprep.subr.bf16.mxu0 %v3657_v51  ;;  %v3738_v51 = vld [vmem:[#allocation4 + $0x44] ss:$8 sps:$4 sm:$0xff]  }
  0xec   :  { %1952 = vmatprep.subr.bf16.mxu1 %v3660_v35  ;;  %v3775_v35 = vld [vmem:[#allocation4 + $0x170] ss:$8 sps:$4 sm:$0xff]  }
  0xee   :  { %1912 = vmatpush1.bf16.msra.mxu0 %v3655_v38  ;;  %v3780_v38 = vld [vmem:[#allocation4 + $0x164] ss:$8 sps:$4 sm:$0xff]  }
  0xef   :  { %1953 = vmatpush1.bf16.msra.mxu1 %v3658_v39  ;;  %1913 = vmatprep.subr.bf16.mxu0 %v3663_v40  ;;  %v3778_v39 = vld [vmem:[#allocation4 + $0x160] ss:$8 sps:$4 sm:$0xff]   ;;  %v3741_v40 = vld [vmem:[#allocation4 + $0x34] ss:$8 sps:$4 sm:$0xff]  }
  0xf0   :  { %1954 = vmatprep.subr.bf16.mxu1 %v3666_v36  ;;  %v3783_v36 = vld [vmem:[#allocation4 + $0x154] ss:$8 sps:$4 sm:$0xff]  }
  0xf2   :  { %1914 = vmatpush1.bf16.msra.mxu0 %v3661_v37  ;;  %v3739_v37 = vld [vmem:[#allocation4 + $0x30] ss:$8 sps:$4 sm:$0xff]  }
  0xf3   :  { %1955 = vmatpush1.bf16.msra.mxu1 %v3664_v41  ;;  %1915 = vmatprep.subr.bf16.mxu0 %v3669_v42  ;;  %v3781_v41 = vld [vmem:[#allocation4 + $0x150] ss:$8 sps:$4 sm:$0xff]   ;;  %v3744_v42 = vld [vmem:[#allocation4 + $0x24] ss:$8 sps:$4 sm:$0xff]  }
  0xf4   :  { %1956 = vmatprep.subr.bf16.mxu1 %v3672_v43  ;;  %v3786_v43 = vld [vmem:[#allocation4 + $0x144] ss:$8 sps:$4 sm:$0xff]  }
  0xf6   :  { %1916 = vmatpush1.bf16.msra.mxu0 %v3667_v44  ;;  %v3742_v44 = vld [vmem:[#allocation4 + $0x20] ss:$8 sps:$4 sm:$0xff]  }
  0xf7   :  { %1957 = vmatpush1.bf16.msra.mxu1 %v3670_v45  ;;  %1917 = vmatprep.subr.bf16.mxu0 %v3675_v46  ;;  %v3784_v45 = vld [vmem:[#allocation4 + $0x140] ss:$8 sps:$4 sm:$0xff]   ;;  %v3747_v46 = vld [vmem:[#allocation4 + $0x14] ss:$8 sps:$4 sm:$0xff]  }
  0xf8   :  { %1958 = vmatprep.subr.bf16.mxu1 %v3678_v48  ;;  %v3789_v48 = vld [vmem:[#allocation4 + $0x134] ss:$8 sps:$4 sm:$0xff]  }
  0xfa   :  { %1918 = vmatpush1.bf16.msra.mxu0 %v3673_v49  ;;  %v3745_v49 = vld [vmem:[#allocation4 + $0x10] ss:$8 sps:$4 sm:$0xff]  }
  0xfb   :  { %1959 = vmatpush1.bf16.msra.mxu1 %v3676_v50  ;;  %1919 = vmatprep.subr.bf16.mxu0 %v3681_v52  ;;  %v3787_v50 = vld [vmem:[#allocation4 + $0x130] ss:$8 sps:$4 sm:$0xff]   ;;  %v3750_v52 = vld [vmem:[#allocation4 + $0x4] ss:$8 sps:$4 sm:$0xff]  }
  0xfc   :  { %1960 = vmatprep.subr.bf16.mxu1 %v3684_v53  ;;  %v3792_v53 = vld [vmem:[#allocation4 + $0x124] ss:$8 sps:$4 sm:$0xff]  }
  0xfe   :  { %1920 = vmatpush2.bf16.msra.mxu0 %v3679_v54  ;;  %v3748_v54 = vld [vmem:[#allocation4] ss:$8 sps:$4 sm:$0xff]  }
  0xff   :  { %1961 = vmatpush2.bf16.msra.mxu1 %v3682_v55  ;;  %1921 = vmatprep.subr.bf16.mxu0 %v3687_v56  ;;  %v3790_v55 = vld [vmem:[#allocation4 + $0x120] ss:$8 sps:$4 sm:$0xff]   ;;  %v3753_v56 = vld [vmem:[#allocation4 + $0xf4] ss:$8 sps:$4 sm:$0xff]  }
 0x100   :  { %1962 = vmatprep.subr.bf16.mxu1 %v3690_v57  ;;  %v3795_v57 = vld [vmem:[#allocation4 + $0x114] ss:$8 sps:$4 sm:$0xff]  }
 0x102   :  { %1922 = vmatpush2.bf16.msra.mxu0 %v3685_v58  ;;  %v3751_v58 = vld [vmem:[#allocation4 + $0xf0] ss:$8 sps:$4 sm:$0xff]  }
 0x103   :  { %1963 = vmatpush2.bf16.msra.mxu1 %v3688_v59  ;;  %1923 = vmatprep.subr.bf16.mxu0 %v3693_v60  ;;  %v3793_v59 = vld [vmem:[#allocation4 + $0x110] ss:$8 sps:$4 sm:$0xff]   ;;  %v3756_v60 = vld [vmem:[#allocation4 + $0xe4] ss:$8 sps:$4 sm:$0xff]  }
 0x104   :  { %1964 = vmatprep.subr.bf16.mxu1 %v3696_v61  ;;  %v3798_v61 = vld [vmem:[#allocation4 + $0x104] ss:$8 sps:$4 sm:$0xff]  }
 0x106   :  { %1924 = vmatpush2.bf16.msra.mxu0 %v3691_v62  ;;  %v3754_v62 = vld [vmem:[#allocation4 + $0xe0] ss:$8 sps:$4 sm:$0xff]  }
 0x107   :  { %1965 = vmatpush2.bf16.msra.mxu1 %v3694_v63  ;;  %1925 = vmatprep.subr.bf16.mxu0 %v3699_v0  ;;  %v3796_v63 = vld [vmem:[#allocation4 + $0x100] ss:$8 sps:$4 sm:$0xff]   ;;  %v3759_v0 = vld [vmem:[#allocation4 + $0xd4] ss:$8 sps:$4 sm:$0xff]  }
 0x108   :  { %1966 = vmatprep.subr.bf16.mxu1 %v3702_v1  ;;  %v3801_v1 = vld [vmem:[#allocation4 + $0x1f4] ss:$8 sps:$4 sm:$0xff]  }
 0x10a   :  { %1926 = vmatpush2.bf16.msra.mxu0 %v3697_v2  ;;  %v3757_v2 = vld [vmem:[#allocation4 + $0xd0] ss:$8 sps:$4 sm:$0xff]  }
 0x10b   :  { %1967 = vmatpush2.bf16.msra.mxu1 %v3700_v3  ;;  %1927 = vmatprep.subr.bf16.mxu0 %v3705_v4  ;;  %v3799_v3 = vld [vmem:[#allocation4 + $0x1f0] ss:$8 sps:$4 sm:$0xff]   ;;  %v3762_v4 = vld [vmem:[#allocation4 + $0xc4] ss:$8 sps:$4 sm:$0xff]  }
 0x10c   :  { %1968 = vmatprep.subr.bf16.mxu1 %v3708_v5  ;;  %v3804_v5 = vld [vmem:[#allocation4 + $0x1e4] ss:$8 sps:$4 sm:$0xff]  }
 0x10e   :  { %1928 = vmatpush2.bf16.msra.mxu0 %v3703_v8  ;;  %v3760_v8 = vld [vmem:[#allocation4 + $0xc0] ss:$8 sps:$4 sm:$0xff]  }
 0x10f   :  { %1969 = vmatpush2.bf16.msra.mxu1 %v3706_v9  ;;  %1929 = vmatprep.subr.bf16.mxu0 %v3711_v10  ;;  %v3802_v9 = vld [vmem:[#allocation4 + $0x1e0] ss:$8 sps:$4 sm:$0xff]   ;;  %v3765_v10 = vld [vmem:[#allocation4 + $0xb4] ss:$8 sps:$4 sm:$0xff]  }
 0x110   :  { %1970 = vmatprep.subr.bf16.mxu1 %v3714_v11  ;;  %v3807_v11 = vld [vmem:[#allocation4 + $0x1d4] ss:$8 sps:$4 sm:$0xff]  }
 0x112   :  { %1930 = vmatpush2.bf16.msra.mxu0 %v3709_v12  ;;  %v329_v12 = vlaneseq }
 0x113   :  { %1971 = vmatpush2.bf16.msra.mxu1 %v3712_v13  ;;  %1931 = vmatprep.subr.bf16.mxu0 %v3717_v14  ;;  %v3763_v13 = vld [vmem:[#allocation4 + $0xb0] ss:$8 sps:$4 sm:$0xff]  }
 0x114   :  { %1972 = vmatprep.subr.bf16.mxu1 %v3720_v15  ;;  %v3805_v14 = vld [vmem:[#allocation4 + $0x1d0] ss:$8 sps:$4 sm:$0xff]   ;;  %v3768_v15 = vld [vmem:[#allocation4 + $0xa4] ss:$8 sps:$4 sm:$0xff]  }
 0x116   :  { %1932 = vmatpush2.bf16.msra.mxu0 %v3715_v18  ;;  %v3810_v18 = vld [vmem:[#allocation4 + $0x1c4] ss:$8 sps:$4 sm:$0xff]  }
 0x117   :  { %1973 = vmatpush2.bf16.msra.mxu1 %v3718_v19  ;;  %1933 = vmatprep.subr.bf16.mxu0 %v3723_v20  ;;  %v4037_v19 = vshrl.u32 %v329_v12, 7  ;;  %v3766_v20 = vld [vmem:[#allocation4 + $0xa0] ss:$8 sps:$4 sm:$0xff]   ;;  %v3834_v12 = vld [vmem:[%s4198_s5 + $0x10] sm:$0xff]  }
 0x118   :  { %1974 = vmatprep.subr.bf16.mxu1 %v3726_v21  ;;  %v3808_v21 = vld [vmem:[#allocation4 + $0x1c0] ss:$8 sps:$4 sm:$0xff]  }
 0x11a   :  { %1934 = vmatpush2.bf16.msra.mxu0 %v3721_v22  ;;  %v3771_v22 = vld [vmem:[#allocation4 + $0x94] ss:$8 sps:$4 sm:$0xff]  }
 0x11b   :  { %1975 = vmatpush2.bf16.msra.mxu1 %v3724_v23  ;;  %2389 = vmatprep.subr.bf16.mxu0 %v3729_v24  ;;  %v3813_v23 = vld [vmem:[#allocation4 + $0x1b4] ss:$8 sps:$4 sm:$0xff]   ;;  %v331_v24 = vsub.s32 0, %v4037_v19 }
 0x11d   :  { %v4027_v27 = vpop.f32.mrf.mxu0  ;;  %1936 = vmatmul.mubr.bf16.vlgmr.msra.gmra.mxu0 %v4013_v16  ;;  %v3777_v16 = vld [vmem:[#allocation4 + $0x174] ss:$8 sps:$4 sm:$0xff]  }
 0x11e   :  { %v4029_v28 = vpop.f32.mrf.mxu1  ;;  %1977 = vmatmul.mubr.bf16.vlgmr.msra.gmra.mxu1 %v4017_v17  ;;  %2390 = vmatpush1.bf16.msra.mxu0 %v3727_v25  ;;  %v3736_v17 = vld [vmem:[#allocation4 + $0x40] ss:$8 sps:$4 sm:$0xff]  }
 0x11f   :  { %v4033_v30 = vpop.f32.mrf.mxu0  ;;  %2391 = vmatprep.subr.bf16.mxu0 %v3732_v26  ;;  %2430 = vmatprep.subr.bf16.mxu1 %v3777_v16  ;;  %v4043_v25 = vld [vmem:[%s4195_s2] sm:$0xf]  ;;  %v335_v26 = vsub.s32 1, %v4037_v19 }
 0x120   :  { %v4035_v31 = vpop.f32.mrf.mxu1  ;;  %2431 = vmatpush1.bf16.msra.mxu1 %v3775_v35  ;;  %v3816_v35 = vld [vmem:[#allocation4 + $0x1a4] ss:$8 sps:$4 sm:$0xff]  }
 0x121   :  { %v1695_v33 = vpop.f32.mrf.mxu0  ;;  %2432 = vmatprep.subr.bf16.mxu1 %v3780_v38  ;;  %v3814_v38 = vld [vmem:[#allocation4 + $0x1a0] ss:$8 sps:$4 sm:$0xff]  }
 0x122   :  { %v1736_v34 = vpop.f32.mrf.mxu1  ;;  %2392 = vmatpush1.bf16.msra.mxu0 %v3730_v29  ;;  %v3769_v29 = vld [vmem:[#allocation4 + $0x90] ss:$8 sps:$4 sm:$0xff]   ;;  %v3774_v33 = vld [vmem:[#allocation4 + $0x84] ss:$8 sps:$4 sm:$0xff]  }
 0x123   :  { %v1696_v47 = vpop.f32.mrf.mxu0  ;;  %2393 = vmatprep.subr.bf16.mxu0 %v3735_v32  ;;  %v3811_v32 = vld [vmem:[#allocation4 + $0x1b0] ss:$8 sps:$4 sm:$0xff]   ;;  %v332_v34 = vrot.slane %v4043_v25, %v331_v24 }
 0x124   :  { %v1737_v7 = vpop.f32.mrf.mxu1  ;;  %2433 = vmatpush1.bf16.msra.mxu1 %v3778_v39  ;;  %v3772_v47 = vld [vmem:[#allocation4 + $0x80] ss:$8 sps:$4 sm:$0xff]  }
 0x125   :  { %2434 = vmatprep.subr.bf16.mxu1 %v3783_v36  ;;  %v1692_v7 = vadd.f32 %v4027_v27, %v332_v34  ;;  %v3817_v27 = vld [vmem:[#allocation4 + $0x190] ss:$8 sps:$4 sm:$0xff]  }
 0x126   :  { %2394 = vmatpush1.bf16.msra.mxu0 %v3733_v6  ;;  %v336_v6 = vrot.slane %v4043_v25, %v335_v26 }
 0x127   :  { %2395 = vmatprep.subr.bf16.mxu0 %v3738_v51  ;;  %v1733_v16 = vadd.f32 %v4029_v28, %v1692_v7 }
 0x128   :  { %2435 = vmatpush1.bf16.msra.mxu1 %v3781_v41  ;;  %v1694_v51 = vadd.f32 %v4033_v30, %v336_v6 }
 0x129   :  { %2436 = vmatprep.subr.bf16.mxu1 %v3786_v43 }
 0x12a   :  { %2396 = vmatpush1.bf16.msra.mxu0 %v3736_v17 }
 0x12b   :  { %2397 = vmatprep.subr.bf16.mxu0 %v3741_v40  ;;  %v1735_v40 = vadd.f32 %v4035_v31, %v1694_v51 }
 0x12c   :  { %2437 = vmatpush1.bf16.msra.mxu1 %v3784_v45 }
 0x12d   :  { %2438 = vmatprep.subr.bf16.mxu1 %v3789_v48 }
 0x12e   :  { %2398 = vmatpush1.bf16.msra.mxu0 %v3739_v37 }
 0x12f   :  { %2399 = vmatprep.subr.bf16.mxu0 %v3744_v42  ;;  %v3819_v42 = vld [vmem:[#allocation4 + $0x194] ss:$8 sps:$4 sm:$0xff]  }
 0x130   :  { %2439 = vmatpush1.bf16.msra.mxu1 %v3787_v50  ;;  %v3822_v50 = vld [vmem:[#allocation4 + $0x184] ss:$8 sps:$4 sm:$0xff]  }
 0x131   :  { %2440 = vmatprep.subr.bf16.mxu1 %v3792_v53  ;;  %v3820_v53 = vld [vmem:[#allocation4 + $0x180] ss:$8 sps:$4 sm:$0xff]  }
 0x132   :  { %2400 = vmatpush1.bf16.msra.mxu0 %v3742_v44 }
 0x133   :  { %2401 = vmatprep.subr.bf16.mxu0 %v3747_v46 }
 0x134   :  { %2441 = vmatpush1.bf16.msra.mxu1 %v3790_v55 }
 0x135   :  { %2442 = vmatprep.subr.bf16.mxu1 %v3795_v57 }
 0x136   :  { %2402 = vmatpush1.bf16.msra.mxu0 %v3745_v49 }
 0x137   :  { %2403 = vmatprep.subr.bf16.mxu0 %v3750_v52 }
 0x138   :  { %2443 = vmatpush1.bf16.msra.mxu1 %v3793_v59 }
 0x139   :  { %2444 = vmatprep.subr.bf16.mxu1 %v3798_v61 }
 0x13a   :  { %2404 = vmatpush1.bf16.msra.mxu0 %v3748_v54 }
 0x13b   :  { %2405 = vmatprep.subr.bf16.mxu0 %v3753_v56 }
 0x13c   :  { %2445 = vmatpush1.bf16.msra.mxu1 %v3796_v63  ;;  %v3823_v63 = vld [vmem:[%s4198_s5 + $0x78] sm:$0xff]  }
 0x13d   :  { %2446 = vmatprep.subr.bf16.mxu1 %v3801_v1  ;;  %v3825_v1 = vld [vmem:[%s4198_s5 + $0x70] sm:$0xff]  }
 0x13e   :  { %2406 = vmatpush2.bf16.msra.mxu0 %v3751_v58 }
 0x13f   :  { %2407 = vmatprep.subr.bf16.mxu0 %v3756_v60 }
 0x140   :  { %2447 = vmatpush2.bf16.msra.mxu1 %v3799_v3  ;;  %v3827_v3 = vld [vmem:[%s4198_s5 + $0x68] sm:$0xff]  }
 0x141   :  { %2448 = vmatprep.subr.bf16.mxu1 %v3804_v5  ;;  %v3829_v5 = vld [vmem:[%s4198_s5 + $0x60] sm:$0xff]  }
 0x142   :  { %2408 = vmatpush2.bf16.msra.mxu0 %v3754_v62 }
 0x143   :  { %2409 = vmatprep.subr.bf16.mxu0 %v3759_v0  ;;  %v3824_v0 = vld [vmem:[%s4198_s5 + $0x38] sm:$0xff]  }
 0x144   :  { %2449 = vmatpush2.bf16.msra.mxu1 %v3802_v9  ;;  %v3831_v9 = vld [vmem:[%s4198_s5 + $0x58] sm:$0xff]  }
 0x145   :  { %2450 = vmatprep.subr.bf16.mxu1 %v3807_v11  ;;  %v3833_v11 = vld [vmem:[%s4198_s5 + $0x50] sm:$0xff]  }
 0x146   :  { %2410 = vmatpush2.bf16.msra.mxu0 %v3757_v2  ;;  %v3826_v2 = vld [vmem:[%s4198_s5 + $0x30] sm:$0xff]  }
 0x147   :  { %2411 = vmatprep.subr.bf16.mxu0 %v3762_v4  ;;  %v3828_v4 = vld [vmem:[%s4198_s5 + $0x28] sm:$0xff]  }
 0x148   :  { %2451 = vmatpush2.bf16.msra.mxu1 %v3805_v14  ;;  %v343_v14 = vsub.s32 3, %v4037_v19 }
 0x149   :  { %2452 = vmatprep.subr.bf16.mxu1 %v3810_v18 }
 0x14a   :  { %2412 = vmatpush2.bf16.msra.mxu0 %v3760_v8  ;;  %v3830_v8 = vld [vmem:[%s4198_s5 + $0x20] sm:$0xff]   ;;  %v344_v18 = vrot.slane %v4043_v25, %v343_v14 }
 0x14b   :  { %2413 = vmatprep.subr.bf16.mxu0 %v3765_v10  ;;  %v3832_v10 = vld [vmem:[%s4198_s5 + $0x18] sm:$0xff]  }
 0x14c   :  { %2453 = vmatpush2.bf16.msra.mxu1 %v3808_v21 }
 0x14d   :  { %2454 = vmatprep.subr.bf16.mxu1 %v3813_v23 }
 0x14e   :  { %2414 = vmatpush2.bf16.msra.mxu0 %v3763_v13  ;;  %v339_v13 = vsub.s32 2, %v4037_v19  ;;  %v3845_v19 = vld [vmem:[%s4200_s7 + $0x8] sm:$0xff]  }
 0x14f   :  { %2415 = vmatprep.subr.bf16.mxu0 %v3768_v15 }
 0x150   :  { %2455 = vmatpush2.bf16.msra.mxu1 %v3811_v32  ;;  %v340_v15 = vrot.slane %v4043_v25, %v339_v13 }
 0x151   :  { %2456 = vmatprep.subr.bf16.mxu1 %v3816_v35 }
 0x152   :  { %2416 = vmatpush2.bf16.msra.mxu0 %v3766_v20 }
 0x153   :  { %2417 = vmatprep.subr.bf16.mxu0 %v3771_v22 }
 0x154   :  { %2457 = vmatpush2.bf16.msra.mxu1 %v3814_v38 }
 0x155   :  { %2458 = vmatprep.subr.bf16.mxu1 %v3819_v42  ;;  %v3836_v42 = vld [vmem:[%s4198_s5 + $0x8] sm:$0xff]  }
 0x156   :  { %2418 = vmatpush2.bf16.msra.mxu0 %v3769_v29 }
 0x157   :  { %2419 = vmatprep.subr.bf16.mxu0 %v3774_v33 }
 0x158   :  { %2459 = vmatpush2.bf16.msra.mxu1 %v3817_v27  ;;  %v3837_v27 = vld [vmem:[%s4198_s5 + $0x40] sm:$0xff]  }
 0x159   :  { %2460 = vmatprep.subr.bf16.mxu1 %v3822_v50  ;;  %v3842_v50 = vld [vmem:[%s4200_s7 + $0x20] sm:$0xff]  }
 0x15a   :  { %2420 = vmatpush2.bf16.msra.mxu0 %v3772_v47 }
 0x15b   :  { %3247 = vmatprep.subr.bf16.mxu0 %v3823_v63 }
 0x15c   :  { %2461 = vmatpush2.bf16.msra.mxu1 %v3820_v53  ;;  %v2057_v53 = vld [vmem:[%s4197_s4] sm:$0x3] }
 0x15d   :  { %v1773_v17 = vpop.f32.mrf.mxu0 }
 0x15e   :  { %v1814_v39 = vpop.f32.mrf.mxu1  ;;  %v1774_v36 = vadd.f32 %v1773_v17, %v1733_v16 }
 0x15f   :  { %v1775_v37 = vpop.f32.mrf.mxu0 }
 0x160   :  { %v1816_v41 = vpop.f32.mrf.mxu1  ;;  %v1815_v43 = vadd.f32 %v1814_v39, %v1774_v36  ;;  %v1776_v44 = vadd.f32 %v1775_v37, %v1735_v40 }
 0x161   :  { %v1777_v45 = vpop.f32.mrf.mxu0 }
 0x162   :  { %v1818_v30 = vpop.f32.mrf.mxu1  ;;  %v1817_v46 = vadd.f32 %v1816_v41, %v1776_v44  ;;  %v1985_v28 = vmax.f32 %v1815_v43, 0.0  ;;  %v3835_v41 = vld [vmem:[%s4198_s5 + $0x48] sm:$0xff]   ;;  %v3838_v45 = vld [vmem:[%s4198_s5] sm:$0xff]  }
 0x163   :  { %v1778_v48 = vpop.f32.mrf.mxu0 }
 0x164   :  { %v1819_v49 = vpop.f32.mrf.mxu1  ;;  %v1986_v52 = vmax.f32 %v1817_v46, 0.0  ;;  %v1989_v54 = vpack.c.bf16 %v1985_v28, %v1985_v28  ;;  %v3839_v46 = vld [vmem:[%s4200_s7 + $0x38] sm:$0xff]   ;;  %v3905_v28 = vmov 0.0   ;;  %v3840_v48 = vld [vmem:[%s4200_s7 + $0x30] sm:$0xff]  }
 0x165   :  { %3287 = vmatprep.subr.bf16.mxu1 %v3905_v28  ;;  %v3841_v49 = vld [vmem:[%s4200_s7 + $0x28] sm:$0xff]  }
 0x166   :  { %v1990_v31 = vpack.c.bf16 %v1986_v52, %v1986_v52  ;;  %v3843_v52 = vld [vmem:[%s4200_s7 + $0x18] sm:$0xff]  }
 0x168   :  { %2421 = vmatprep.mubr.bf16.mxu0 %v1990_v31  ;;  %v2062_v31 = vrot.slane %v2057_v53, %v331_v24  ;;  %v3844_v24 = vld [vmem:[%s4200_s7 + $0x10] sm:$0xff]  }
 0x169   :  { %2422 = vmatmul.mubr.bf16.vlgmr.msra.gmra.mxu0 %v1989_v54  ;;  %v2066_v54 = vrot.slane %v2057_v53, %v335_v26  ;;  %v3846_v26 = vld [vmem:[%s4200_s7] sm:$0xff]  }
 0x16a   :  { %3248 = vmatpush3.bf16.msra.mxu0 %v3824_v0 }
 0x16b   :  { %3249 = vmatprep.subr.bf16.mxu0 %v3825_v1 }
 0x16e   :  { %3250 = vmatpush3.bf16.msra.mxu0 %v3826_v2 }
 0x16f   :  { %3251 = vmatprep.subr.bf16.mxu0 %v3827_v3  ;;  %v3847_v3 = vld [vmem:[%s4202_s9 + $0x38] sm:$0xff]  }
 0x172   :  { %3252 = vmatpush3.bf16.msra.mxu0 %v3828_v4  ;;  %v3848_v4 = vld [vmem:[%s4202_s9 + $0x30] sm:$0xff]  }
 0x173   :  { %3253 = vmatprep.subr.bf16.mxu0 %v3829_v5  ;;  %v3849_v5 = vld [vmem:[%s4202_s9 + $0x28] sm:$0xff]  }
 0x176   :  { %3254 = vmatpush3.bf16.msra.mxu0 %v3830_v8  ;;  %v3850_v8 = vld [vmem:[%s4202_s9 + $0x20] sm:$0xff]  }
 0x177   :  { %3255 = vmatprep.subr.bf16.mxu0 %v3831_v9  ;;  %v3851_v9 = vld [vmem:[%s4202_s9 + $0x18] sm:$0xff]  }
 0x17a   :  { %3256 = vmatpush3.bf16.msra.mxu0 %v3832_v10  ;;  %v3852_v10 = vld [vmem:[%s4202_s9 + $0x10] sm:$0xff]  }
 0x17b   :  { %3257 = vmatprep.subr.bf16.mxu0 %v3833_v11 }
 0x17e   :  { %3258 = vmatpush3.bf16.msra.mxu0 %v3834_v12  ;;  %v3212_v12 = vld [vmem:[%s4199_s6] ss:$0 sm:$0xff] }
 0x17f   :  { %3259 = vmatprep.subr.bf16.mxu0 %v3835_v41 }
 0x182   :  { %3260 = vmatpush3.bf16.msra.mxu0 %v3836_v42 }
 0x183   :  { %3261 = vmatprep.subr.bf16.mxu0 %v3837_v27 }
 0x186   :  { %3262 = vmatpush3.bf16.msra.mxu0 %v3838_v45 }
 0x187   :  { %3307 = vmatprep.subr.bf16.mxu0 %v3905_v28 }
 0x19d   :  { %v1855_v55 = vpop.f32.mrf.mxu0 }
 0x19e   :  { %v1896_v56 = vpop.f32.mrf.mxu1  ;;  %v1856_v20 = vadd.f32 %v1855_v55, %v340_v15 }
 0x19f   :  { %v1857_v57 = vpop.f32.mrf.mxu0 }
 0x1a0   :  { %v1898_v58 = vpop.f32.mrf.mxu1  ;;  %v1858_v21 = vadd.f32 %v1857_v57, %v344_v18  ;;  %v1897_v22 = vadd.f32 %v1896_v56, %v1856_v20 }
 0x1a1   :  { %v1859_v59 = vpop.f32.mrf.mxu0 }
 0x1a2   :  { %v1900_v60 = vpop.f32.mrf.mxu1  ;;  %v1899_v32 = vadd.f32 %v1898_v58, %v1858_v21 }
 0x1a3   :  { %v1860_v61 = vpop.f32.mrf.mxu0 }
 0x1a4   :  { %v1901_v62 = vpop.f32.mrf.mxu1 }
 0x1dd   :  { %v1937_v23 = vpop.f32.mrf.mxu0 }
 0x1de   :  { %v1978_v29 = vpop.f32.mrf.mxu1  ;;  %v1938_v33 = vadd.f32 %v1937_v23, %v1897_v22  ;;  %v3853_v23 = vld [vmem:[%s4202_s9 + $0x8] sm:$0xff]  }
 0x1df   :  { %v1939_v34 = vpop.f32.mrf.mxu0 }
 0x1e0   :  { %v1980_v6 = vpop.f32.mrf.mxu1  ;;  %v1979_v47 = vadd.f32 %v1978_v29, %v1938_v33  ;;  %v1940_v7 = vadd.f32 %v1939_v34, %v1899_v32  ;;  %v3854_v29 = vld [vmem:[%s4202_s9] sm:$0xff]  }
 0x1e1   :  { %v1941_v51 = vpop.f32.mrf.mxu0  ;;  %v3229_v32 = vld [vmem:[%s4201_s8] ss:$0 sm:$0xff] }
 0x1e2   :  { %v1982_v35 = vpop.f32.mrf.mxu1  ;;  %v1981_v16 = vadd.f32 %v1980_v6, %v1940_v7  ;;  %v1987_v38 = vmax.f32 %v1979_v47, 0.0 }
 0x1e3   :  { %v1942_v17 = vpop.f32.mrf.mxu0 }
 0x1e4   :  { %v1983_v39 = vpop.f32.mrf.mxu1  ;;  %v1988_v40 = vmax.f32 %v1981_v16, 0.0  ;;  %v1991_v25 = vpack.c.bf16 %v1987_v38, %v1987_v38  ;;  %v3238_v16 = vld [vmem:[%s4203_s10] ss:$0 sm:$0xff] }
 0x1e6   :  { %v1992_v36 = vpack.c.bf16 %v1988_v40, %v1988_v40 }
 0x1e8   :  { %2462 = vmatprep.mubr.bf16.mxu1 %v1992_v36 }
 0x1e9   :  { %2463 = vmatmul.mubr.bf16.vlgmr.msra.gmra.mxu1 %v1991_v25 }
 0x1ea   :  { %3288 = vmatpush3.bf16.msra.mxu1 %v3839_v46  ;;  %3303 = vmatprep.mubr.msk.bf16.mxu1 %vm3906_vm0, %v3905_v28 }
 0x1eb   :  { %3289 = vmatprep.subr.bf16.mxu1 %v3905_v28 }
 0x1ee   :  { %3290 = vmatpush3.bf16.msra.mxu1 %v3840_v48 }
 0x1ef   :  { %3291 = vmatprep.subr.bf16.mxu1 %v3905_v28 }
 0x1f2   :  { %3292 = vmatpush3.bf16.msra.mxu1 %v3841_v49 }
 0x1f3   :  { %3293 = vmatprep.subr.bf16.mxu1 %v3905_v28 }
 0x1f6   :  { %3294 = vmatpush3.bf16.msra.mxu1 %v3842_v50 }
 0x1f7   :  { %3295 = vmatprep.subr.bf16.mxu1 %v3905_v28 }
 0x1fa   :  { %3296 = vmatpush3.bf16.msra.mxu1 %v3843_v52 }
 0x1fb   :  { %3297 = vmatprep.subr.bf16.mxu1 %v3905_v28 }
 0x1fe   :  { %3298 = vmatpush3.bf16.msra.mxu1 %v3844_v24 }
 0x1ff   :  { %3299 = vmatprep.subr.bf16.mxu1 %v3905_v28 }
 0x202   :  { %3300 = vmatpush3.bf16.msra.mxu1 %v3845_v19 }
 0x203   :  { %3301 = vmatprep.subr.bf16.mxu1 %v3905_v28 }
 0x206   :  { %3302 = vmatpush3.bf16.msra.mxu1 %v3846_v26 }
 0x229   :  { %v2423_v37 = vpop.f32.mrf.mxu0 }
 0x22a   :  { %v2424_v55 = vadd.f32 %v2423_v37, %v2062_v31 }
 0x22b   :  { %v2425_v43 = vpop.f32.mrf.mxu0 }
 0x22c   :  { %v2426_v57 = vadd.f32 %v2425_v43, %v2066_v54 }
 0x22d   :  { %v2427_v44 = vpop.f32.mrf.mxu0 }
 0x22f   :  { %v2428_v30 = vpop.f32.mrf.mxu0 }
 0x2a9   :  { %v2464_v56 = vpop.f32.mrf.mxu1 }
 0x2aa   :  { %v2465_v58 = vadd.f32 %v2464_v56, %v2424_v55 }
 0x2ab   :  { %v2466_v59 = vpop.f32.mrf.mxu1 }
 0x2ac   :  { %v2467_v60 = vadd.f32 %v2466_v59, %v2426_v57  ;;  %v2471_v61 = vmax.f32 %v2465_v58, 0.0 }
 0x2ad   :  { %v2468_v62 = vpop.f32.mrf.mxu1 }
 0x2ae   :  { %v2472_v63 = vmax.f32 %v2467_v60, 0.0  ;;  %v2473_v2 = vpack.c.bf16 %v2471_v61, %v2471_v61 }
 0x2af   :  { %v2469_v0 = vpop.f32.mrf.mxu1 }
 0x2b0   :  { %v2474_v1 = vpack.c.bf16 %v2472_v63, %v2472_v63 }
 0x2b2   :  { %2642 = vmatprep.mubr.bf16.mxu0 %v2474_v1 }
 0x2b3   :  { %2643 = vmatmul.mubr.bf16.vlgmr.msra.gmra.mxu0 %v2473_v2 }
 0x2b4   :  { %3323 = vmatprep.mubr.msk.bf16.mxu0 %vm3906_vm0, %v3905_v28  ;;  %3308 = vmatpush3.bf16.msra.mxu0 %v3847_v3 }
 0x2b5   :  { %3309 = vmatprep.subr.bf16.mxu0 %v3905_v28 }
 0x2b8   :  { %3310 = vmatpush3.bf16.msra.mxu0 %v3848_v4 }
 0x2b9   :  { %3311 = vmatprep.subr.bf16.mxu0 %v3905_v28 }
 0x2bc   :  { %3312 = vmatpush3.bf16.msra.mxu0 %v3849_v5 }
 0x2bd   :  { %3313 = vmatprep.subr.bf16.mxu0 %v3905_v28 }
 0x2c0   :  { %3314 = vmatpush3.bf16.msra.mxu0 %v3850_v8 }
 0x2c1   :  { %3315 = vmatprep.subr.bf16.mxu0 %v3905_v28 }
 0x2c4   :  { %3316 = vmatpush3.bf16.msra.mxu0 %v3851_v9 }
 0x2c5   :  { %3317 = vmatprep.subr.bf16.mxu0 %v3905_v28 }
 0x2c8   :  { %3318 = vmatpush3.bf16.msra.mxu0 %v3852_v10 }
 0x2c9   :  { %3319 = vmatprep.subr.bf16.mxu0 %v3905_v28 }
 0x2cc   :  { %3320 = vmatpush3.bf16.msra.mxu0 %v3853_v23 }
 0x2cd   :  { %3321 = vmatprep.subr.bf16.mxu0 %v3905_v28 }
 0x2d0   :  { %3322 = vmatpush3.bf16.msra.mxu0 %v3854_v29 }
 0x373   :  { %v3263_v11 = vpop.f32.mrf.mxu0 }
 0x375   :  { %v3264_v13 = vpop.f32.mrf.mxu0 }
 0x376   :  { %v3265_v14 = vadd.f32 %v3264_v13, %v3263_v11 }
 0x377   :  { %v3266_v15 = vpop.f32.mrf.mxu0 }
 0x378   :  { %v2645_v18 = vadd.f32 %v3265_v14, %v3212_v12 }
 0x379   :  { %v3267_v20 = vpop.f32.mrf.mxu0 }
 0x37a   :  { %v2650_v21 = vmax.f32 %v2645_v18, 0.0 }
 0x37c   :  { %v2651_v22 = vpack.c.bf16 %v2650_v21, %v2650_v21 }
 0x37e   :  { %3304 = vmatmul.mubr.bf16.vlgmr.msra.gmra.mxu1 %v2651_v22 }
 0x43e   :  { %v2757_v33 = vpop.f32.mrf.mxu1 }
 0x43f   :  { %v2758_v34 = vadd.f32 %v3229_v32, %v2757_v33 }
 0x440   :  { %v3305_v6 = vpop.f32.mrf.mxu1 }
 0x441   :  { %v2763_v47 = vmax.f32 %v2758_v34, 0.0 }
 0x442   :  { %v2760_v7 = vpop.f32.mrf.mxu1 }
 0x443   :  { %v2764_v51 = vpack.c.bf16 %v2763_v47, %v2763_v47 }
 0x444   :  { %v3306_v35 = vpop.f32.mrf.mxu1 }
 0x445   :  { %3324 = vmatmul.mubr.bf16.vlgmr.msra.gmra.mxu0 %v2764_v51 }
 0x505   :  { %v2870_v38 = vpop.f32.mrf.mxu0 }
 0x506   :  { %v2871_v17 = vadd.f32 %v3238_v16, %v2870_v38 }
 0x507   :  { %v3325_v39 = vpop.f32.mrf.mxu0 }
 0x508   :  { %v2876_v40 = vpack.c.bf16 %v2871_v17, %v2871_v17 }
 0x509   :  { %v2873_v36 = vpop.f32.mrf.mxu0 }
 0x50a   :  { %2877 = vst [vmem:[%s4204_s11] sm:$0xf] %v2876_v40 }
 0x50b   :  { %v3326_v25 = vpop.f32.mrf.mxu0 }
 0x50c   :  { %2882 = vsyncpa [#allocation3], 1 }
 0x50d   :  { %2883 = vsyncpa [#allocation5], 1 }

</bundles_post_ra>
